<compile_context>
chip_gen: v5e
topology: v5e:2x2
jax: 0.10.0
libtpu: 0.0.40
codegen_flags: <defaults>
</compile_context>

<pallas_src>
import jax
import jax.numpy as jnp
from jax.experimental import pallas as pl
from jax.experimental.pallas import tpu as pltpu

CLAMP_MIN = 123.0   # self.min
CLAMP_MAX = 457.0   # self.max
BN_EPS = 1e-5


def conv_bn_clamp_kernel(x_ref, p_ref, o_ref):
    # x_ref: VMEM (N, C_in, L) f32
    # p_ref: SMEM flat f32[C_out*C_in*K + 2*C_out]:
    #        [ w (C_out,C_in,K row-major) | gamma (C_out) | beta (C_out) ]
    # o_ref: VMEM (N*C_out, L_out) f32, row r = n*C_out + co  (already the
    #        final PyTorch (N, C_out, L_out) row order -> wrapper reshape is free)
    N, C_in, L = x_ref.shape
    n_rows, L_out = o_ref.shape
    C_out = n_rows // N
    K = L - L_out + 1

    w_base = 0
    g_base = C_out * C_in * K
    b_base = g_base + C_out

    x = x_ref[...]                                          # (N, C_in, L)

    # Hoist the per-channel sublane extracts (C_in of them), then take the K
    # lane-shifted taps from each hoisted slab: C_in*K unique slices total,
    # reused by all C_out output channels.
    taps = []
    for ci in range(C_in):
        xc = x[:, ci, :]                                    # (N, L)
        taps.append([xc[:, k:k + L_out] for k in range(K)])

    inv_n = 1.0 / float(N * L_out)
    rows = [None] * (N * C_out)

    for co in range(C_out):
        # ---- Conv1d (stride=1, pad=0): fully unrolled scalar-broadcast MAC ----
        # Conv bias intentionally NOT added: a per-channel constant is removed
        # exactly by the training-mode BN batch-mean subtraction below.
        acc = None
        for ci in range(C_in):
            for k in range(K):
                w = p_ref[w_base + co * C_in * K + ci * K + k]
                term = taps[ci][k] * w
                acc = term if acc is None else acc + term   # (N, L_out)

        # ---- BatchNorm1d training-mode stats (biased var), fused in one
        #      cross-lane reduce over the concatenated [acc ; acc*acc] slab
        #      while acc is live ----
        both = jnp.concatenate([acc, acc * acc], axis=0)    # (2N, L_out), one vreg
        part = jnp.sum(both, axis=1, keepdims=True)         # (2N, 1)
        sum_v = jnp.sum(part[:N, :], keepdims=True)         # (1, 1)
        sum_v2 = jnp.sum(part[N:, :], keepdims=True)        # (1, 1)
        mean = sum_v * inv_n
        var = jnp.maximum(sum_v2 * inv_n - mean * mean, 0.0)    # guard f32 cancellation
        s = p_ref[g_base + co] * jax.lax.rsqrt(var + BN_EPS)    # (1, 1)
        t = p_ref[b_base + co] - mean * s                       # (1, 1)

        # normalize + affine folded into y = clamp(acc*s + t)
        y = jnp.minimum(jnp.maximum(acc * s + t, CLAMP_MIN), CLAMP_MAX)  # (N, L_out)

        for n in range(N):
            rows[n * C_out + co] = y[n:n + 1, :]

    # Single dense (8, 128) slab in final (n, co) row order -> one unmasked
    # full-vreg store; no transpose needed outside.
    o_ref[...] = jnp.concatenate(rows, axis=0)


def model_forward(x, w, b, gamma, beta):
    """x: (N, C_in, L); w: (C_out, C_in, K) PyTorch layout; b/gamma/beta: (C_out,)."""
    N, C_in, L = x.shape
    C_out, _, K = w.shape
    L_out = L - K + 1
    del b  # conv bias cancels exactly under training-mode BN mean subtraction
    # TODO(synk): running_mean / running_var momentum updates are a training
    # side effect that does not change the forward output; not materialized.

    # Pack all tiny parameters into one flat SMEM operand (one DMA).
    params = jnp.concatenate([
        w.astype(jnp.float32).reshape(-1),        # C_out*C_in*K = 40
        gamma.astype(jnp.float32).reshape(-1),    # C_out = 4
        beta.astype(jnp.float32).reshape(-1),     # C_out = 4
    ])

    # TODO(synk): if N or L ever scale, add a grid over N / L blocks (>=512
    # lanes) with BlockSpec pipelining and a two-stage BN reduction; size the
    # blocks against v7x's 64 MiB VMEM and mark N/L axes "parallel" for its
    # 2 TensorCores. At the current footprint (<32 KB) a single no-grid
    # invocation is optimal on all generations.
    out_flat = pl.pallas_call(
        conv_bn_clamp_kernel,
        out_shape=jax.ShapeDtypeStruct((N * C_out, L_out), jnp.float32),
        in_specs=[
            pl.BlockSpec(memory_space=pltpu.MemorySpace.VMEM),   # x
            pl.BlockSpec(memory_space=pltpu.MemorySpace.SMEM),   # packed w|gamma|beta
        ],
        out_specs=pl.BlockSpec(memory_space=pltpu.MemorySpace.VMEM),
    )(x.astype(jnp.float32), params)

    # Rows are already in (n, co) order -> free row-major reshape only.
    return out_flat.reshape(N, C_out, L_out)


def reference_forward(x, w, b, gamma, beta):
    """Pure-JAX reference matching PyTorch semantics (training-mode BN)."""
    N, C_in, L = x.shape
    C_out, _, K = w.shape
    L_out = L - K + 1
    conv = jnp.zeros((N, C_out, L_out), jnp.float32) + b.reshape(1, C_out, 1)
    for k in range(K):
        conv = conv + jnp.einsum("ncl,oc->nol", x[:, :, k:k + L_out], w[:, :, k])
    mean = jnp.mean(conv, axis=(0, 2), keepdims=True)
    var = jnp.mean((conv - mean) ** 2, axis=(0, 2), keepdims=True)
    y = (conv - mean) * jax.lax.rsqrt(var + BN_EPS)
    y = y * gamma.reshape(1, C_out, 1) + beta.reshape(1, C_out, 1)
    return jnp.clip(y, CLAMP_MIN, CLAMP_MAX)


if __name__ == "__main__":
    # Small shapes consistent with the module: Conv1d(2 -> 4, kernel=5).
    N, C_IN, C_OUT, K, L = 2, 2, 4, 5, 132   # L_out = 128 (lane-dense output)

    key = jax.random.PRNGKey(0)
    kx, kw, kb, kg, kbeta = jax.random.split(key, 5)

    x = jax.random.normal(kx, (N, C_IN, L), dtype=jnp.float32)

    # PyTorch-style Conv1d init (uniform with bound 1/sqrt(C_in*K)).
    bound = 1.0 / jnp.sqrt(float(C_IN * K))
    w = jax.random.uniform(kw, (C_OUT, C_IN, K), jnp.float32, -bound, bound)
    b = jax.random.uniform(kb, (C_OUT,), jnp.float32, -bound, bound)

    # Non-trivial BN affine params so the [123, 457] clamp window is actually
    # exercised (default gamma=1/beta=0 would clamp everything to 123).
    gamma = jax.random.uniform(kg, (C_OUT,), jnp.float32, 80.0, 220.0)
    beta = jax.random.uniform(kbeta, (C_OUT,), jnp.float32, 150.0, 400.0)

    out = jax.block_until_ready(model_forward(x, w, b, gamma, beta))
    ref = jax.block_until_ready(reference_forward(x, w, b, gamma, beta))

    assert out.shape == (N, C_OUT, L - K + 1)
    assert jnp.allclose(out, ref, atol=1e-3, rtol=1e-4)

    print("KERNEL_OK")
</pallas_src>

<mosaic_0001>
module attributes {stable_mosaic.version = 11 : i64} {
  func.func @conv_bn_clamp_kernel(%arg0: memref<2x2x132xf32, #tpu.memory_space<vmem>>, %arg1: memref<48xf32, #tpu.memory_space<smem>>, %arg2: memref<8x128xf32, #tpu.memory_space<vmem>>) attributes {dimension_semantics = [], scalar_prefetch = 0 : i64, scratch_operands = 0 : i64, tpu.core_type = #tpu.core_type<tc>} {
    %c0 = arith.constant 0 : index
    %c0_0 = arith.constant 0 : index
    %c0_1 = arith.constant 0 : index
    %0 = vector.load %arg0[%c0, %c0_0, %c0_1] : memref<2x2x132xf32, #tpu.memory_space<vmem>>, vector<2x2x132xf32>
    %1 = vector.extract_strided_slice %0 {offsets = [0, 0, 0], sizes = [2, 1, 132], strides = [1, 1, 1]} : vector<2x2x132xf32> to vector<2x1x132xf32>
    %2 = vector.shape_cast %1 : vector<2x1x132xf32> to vector<2x132xf32>
    %3 = vector.extract_strided_slice %2 {offsets = [0, 0], sizes = [2, 128], strides = [1, 1]} : vector<2x132xf32> to vector<2x128xf32>
    %4 = vector.extract_strided_slice %2 {offsets = [0, 1], sizes = [2, 128], strides = [1, 1]} : vector<2x132xf32> to vector<2x128xf32>
    %5 = vector.extract_strided_slice %2 {offsets = [0, 2], sizes = [2, 128], strides = [1, 1]} : vector<2x132xf32> to vector<2x128xf32>
    %6 = vector.extract_strided_slice %2 {offsets = [0, 3], sizes = [2, 128], strides = [1, 1]} : vector<2x132xf32> to vector<2x128xf32>
    %7 = vector.extract_strided_slice %2 {offsets = [0, 4], sizes = [2, 128], strides = [1, 1]} : vector<2x132xf32> to vector<2x128xf32>
    %8 = vector.extract_strided_slice %0 {offsets = [0, 1, 0], sizes = [2, 1, 132], strides = [1, 1, 1]} : vector<2x2x132xf32> to vector<2x1x132xf32>
    %9 = vector.shape_cast %8 : vector<2x1x132xf32> to vector<2x132xf32>
    %10 = vector.extract_strided_slice %9 {offsets = [0, 0], sizes = [2, 128], strides = [1, 1]} : vector<2x132xf32> to vector<2x128xf32>
    %11 = vector.extract_strided_slice %9 {offsets = [0, 1], sizes = [2, 128], strides = [1, 1]} : vector<2x132xf32> to vector<2x128xf32>
    %12 = vector.extract_strided_slice %9 {offsets = [0, 2], sizes = [2, 128], strides = [1, 1]} : vector<2x132xf32> to vector<2x128xf32>
    %13 = vector.extract_strided_slice %9 {offsets = [0, 3], sizes = [2, 128], strides = [1, 1]} : vector<2x132xf32> to vector<2x128xf32>
    %14 = vector.extract_strided_slice %9 {offsets = [0, 4], sizes = [2, 128], strides = [1, 1]} : vector<2x132xf32> to vector<2x128xf32>
    %c0_2 = arith.constant 0 : index
    %15 = memref.load %arg1[%c0_2] : memref<48xf32, #tpu.memory_space<smem>>
    %16 = vector.broadcast %15 : f32 to vector<2x128xf32>
    %17 = arith.mulf %3, %16 : vector<2x128xf32>
    %c1 = arith.constant 1 : index
    %18 = memref.load %arg1[%c1] : memref<48xf32, #tpu.memory_space<smem>>
    %19 = vector.broadcast %18 : f32 to vector<2x128xf32>
    %20 = arith.mulf %4, %19 : vector<2x128xf32>
    %21 = arith.addf %17, %20 : vector<2x128xf32>
    %c2 = arith.constant 2 : index
    %22 = memref.load %arg1[%c2] : memref<48xf32, #tpu.memory_space<smem>>
    %23 = vector.broadcast %22 : f32 to vector<2x128xf32>
    %24 = arith.mulf %5, %23 : vector<2x128xf32>
    %25 = arith.addf %21, %24 : vector<2x128xf32>
    %c3 = arith.constant 3 : index
    %26 = memref.load %arg1[%c3] : memref<48xf32, #tpu.memory_space<smem>>
    %27 = vector.broadcast %26 : f32 to vector<2x128xf32>
    %28 = arith.mulf %6, %27 : vector<2x128xf32>
    %29 = arith.addf %25, %28 : vector<2x128xf32>
    %c4 = arith.constant 4 : index
    %30 = memref.load %arg1[%c4] : memref<48xf32, #tpu.memory_space<smem>>
    %31 = vector.broadcast %30 : f32 to vector<2x128xf32>
    %32 = arith.mulf %7, %31 : vector<2x128xf32>
    %33 = arith.addf %29, %32 : vector<2x128xf32>
    %c5 = arith.constant 5 : index
    %34 = memref.load %arg1[%c5] : memref<48xf32, #tpu.memory_space<smem>>
    %35 = vector.broadcast %34 : f32 to vector<2x128xf32>
    %36 = arith.mulf %10, %35 : vector<2x128xf32>
    %37 = arith.addf %33, %36 : vector<2x128xf32>
    %c6 = arith.constant 6 : index
    %38 = memref.load %arg1[%c6] : memref<48xf32, #tpu.memory_space<smem>>
    %39 = vector.broadcast %38 : f32 to vector<2x128xf32>
    %40 = arith.mulf %11, %39 : vector<2x128xf32>
    %41 = arith.addf %37, %40 : vector<2x128xf32>
    %c7 = arith.constant 7 : index
    %42 = memref.load %arg1[%c7] : memref<48xf32, #tpu.memory_space<smem>>
    %43 = vector.broadcast %42 : f32 to vector<2x128xf32>
    %44 = arith.mulf %12, %43 : vector<2x128xf32>
    %45 = arith.addf %41, %44 : vector<2x128xf32>
    %c8 = arith.constant 8 : index
    %46 = memref.load %arg1[%c8] : memref<48xf32, #tpu.memory_space<smem>>
    %47 = vector.broadcast %46 : f32 to vector<2x128xf32>
    %48 = arith.mulf %13, %47 : vector<2x128xf32>
    %49 = arith.addf %45, %48 : vector<2x128xf32>
    %c9 = arith.constant 9 : index
    %50 = memref.load %arg1[%c9] : memref<48xf32, #tpu.memory_space<smem>>
    %51 = vector.broadcast %50 : f32 to vector<2x128xf32>
    %52 = arith.mulf %14, %51 : vector<2x128xf32>
    %53 = arith.addf %49, %52 : vector<2x128xf32>
    %54 = arith.mulf %53, %53 : vector<2x128xf32>
    %55 = tpu.concatenate %53, %54 in 0 : vector<2x128xf32>, vector<2x128xf32> -> vector<4x128xf32>
    %cst = arith.constant dense<0.000000e+00> : vector<4xf32>
    %56 = vector.multi_reduction <add>, %55, %cst [1] : vector<4x128xf32> to vector<4xf32>
    %57 = vector.shape_cast %56 : vector<4xf32> to vector<4x1xf32>
    %58 = vector.extract_strided_slice %57 {offsets = [0, 0], sizes = [2, 1], strides = [1, 1]} : vector<4x1xf32> to vector<2x1xf32>
    %59 = vector.shape_cast %58 : vector<2x1xf32> to vector<1x2x1xf32>
    %cst_3 = arith.constant dense<0.000000e+00> : vector<1xf32>
    %60 = vector.multi_reduction <add>, %59, %cst_3 [1, 2] : vector<1x2x1xf32> to vector<1xf32>
    %61 = vector.shape_cast %60 : vector<1xf32> to vector<1x1x1xf32>
    %62 = vector.extract %61[0, 0, 0] : f32 from vector<1x1x1xf32>
    %63 = vector.broadcast %62 : f32 to vector<1x1xf32>
    %64 = vector.extract_strided_slice %57 {offsets = [2, 0], sizes = [2, 1], strides = [1, 1]} : vector<4x1xf32> to vector<2x1xf32>
    %65 = vector.shape_cast %64 : vector<2x1xf32> to vector<1x2x1xf32>
    %cst_4 = arith.constant dense<0.000000e+00> : vector<1xf32>
    %66 = vector.multi_reduction <add>, %65, %cst_4 [1, 2] : vector<1x2x1xf32> to vector<1xf32>
    %67 = vector.shape_cast %66 : vector<1xf32> to vector<1x1x1xf32>
    %68 = vector.extract %67[0, 0, 0] : f32 from vector<1x1x1xf32>
    %69 = vector.broadcast %68 : f32 to vector<1x1xf32>
    %cst_5 = arith.constant 3.906250e-03 : f32
    %70 = vector.broadcast %cst_5 : f32 to vector<1x1xf32>
    %71 = arith.mulf %63, %70 : vector<1x1xf32>
    %cst_6 = arith.constant 3.906250e-03 : f32
    %72 = vector.broadcast %cst_6 : f32 to vector<1x1xf32>
    %73 = arith.mulf %69, %72 : vector<1x1xf32>
    %74 = arith.mulf %71, %71 : vector<1x1xf32>
    %75 = arith.subf %73, %74 : vector<1x1xf32>
    %cst_7 = arith.constant 0.000000e+00 : f32
    %76 = vector.broadcast %cst_7 : f32 to vector<1x1xf32>
    %77 = arith.maximumf %75, %76 : vector<1x1xf32>
    %c40 = arith.constant 40 : index
    %78 = memref.load %arg1[%c40] : memref<48xf32, #tpu.memory_space<smem>>
    %cst_8 = arith.constant 9.99999974E-6 : f32
    %79 = vector.broadcast %cst_8 : f32 to vector<1x1xf32>
    %80 = arith.addf %77, %79 : vector<1x1xf32>
    %81 = math.rsqrt %80 : vector<1x1xf32>
    %82 = vector.broadcast %78 : f32 to vector<1x1xf32>
    %83 = arith.mulf %82, %81 : vector<1x1xf32>
    %c44 = arith.constant 44 : index
    %84 = memref.load %arg1[%c44] : memref<48xf32, #tpu.memory_space<smem>>
    %85 = arith.mulf %71, %83 : vector<1x1xf32>
    %86 = vector.broadcast %84 : f32 to vector<1x1xf32>
    %87 = arith.subf %86, %85 : vector<1x1xf32>
    %88 = vector.broadcast %83 : vector<1x1xf32> to vector<2x128xf32>
    %89 = arith.mulf %53, %88 : vector<2x128xf32>
    %90 = vector.broadcast %87 : vector<1x1xf32> to vector<2x128xf32>
    %91 = arith.addf %89, %90 : vector<2x128xf32>
    %cst_9 = arith.constant 1.230000e+02 : f32
    %92 = vector.broadcast %cst_9 : f32 to vector<2x128xf32>
    %93 = arith.maximumf %91, %92 : vector<2x128xf32>
    %cst_10 = arith.constant 4.570000e+02 : f32
    %94 = vector.broadcast %cst_10 : f32 to vector<2x128xf32>
    %95 = arith.minimumf %93, %94 : vector<2x128xf32>
    %96 = vector.extract_strided_slice %95 {offsets = [0, 0], sizes = [1, 128], strides = [1, 1]} : vector<2x128xf32> to vector<1x128xf32>
    %97 = vector.extract_strided_slice %95 {offsets = [1, 0], sizes = [1, 128], strides = [1, 1]} : vector<2x128xf32> to vector<1x128xf32>
    %c10 = arith.constant 10 : index
    %98 = memref.load %arg1[%c10] : memref<48xf32, #tpu.memory_space<smem>>
    %99 = vector.broadcast %98 : f32 to vector<2x128xf32>
    %100 = arith.mulf %3, %99 : vector<2x128xf32>
    %c11 = arith.constant 11 : index
    %101 = memref.load %arg1[%c11] : memref<48xf32, #tpu.memory_space<smem>>
    %102 = vector.broadcast %101 : f32 to vector<2x128xf32>
    %103 = arith.mulf %4, %102 : vector<2x128xf32>
    %104 = arith.addf %100, %103 : vector<2x128xf32>
    %c12 = arith.constant 12 : index
    %105 = memref.load %arg1[%c12] : memref<48xf32, #tpu.memory_space<smem>>
    %106 = vector.broadcast %105 : f32 to vector<2x128xf32>
    %107 = arith.mulf %5, %106 : vector<2x128xf32>
    %108 = arith.addf %104, %107 : vector<2x128xf32>
    %c13 = arith.constant 13 : index
    %109 = memref.load %arg1[%c13] : memref<48xf32, #tpu.memory_space<smem>>
    %110 = vector.broadcast %109 : f32 to vector<2x128xf32>
    %111 = arith.mulf %6, %110 : vector<2x128xf32>
    %112 = arith.addf %108, %111 : vector<2x128xf32>
    %c14 = arith.constant 14 : index
    %113 = memref.load %arg1[%c14] : memref<48xf32, #tpu.memory_space<smem>>
    %114 = vector.broadcast %113 : f32 to vector<2x128xf32>
    %115 = arith.mulf %7, %114 : vector<2x128xf32>
    %116 = arith.addf %112, %115 : vector<2x128xf32>
    %c15 = arith.constant 15 : index
    %117 = memref.load %arg1[%c15] : memref<48xf32, #tpu.memory_space<smem>>
    %118 = vector.broadcast %117 : f32 to vector<2x128xf32>
    %119 = arith.mulf %10, %118 : vector<2x128xf32>
    %120 = arith.addf %116, %119 : vector<2x128xf32>
    %c16 = arith.constant 16 : index
    %121 = memref.load %arg1[%c16] : memref<48xf32, #tpu.memory_space<smem>>
    %122 = vector.broadcast %121 : f32 to vector<2x128xf32>
    %123 = arith.mulf %11, %122 : vector<2x128xf32>
    %124 = arith.addf %120, %123 : vector<2x128xf32>
    %c17 = arith.constant 17 : index
    %125 = memref.load %arg1[%c17] : memref<48xf32, #tpu.memory_space<smem>>
    %126 = vector.broadcast %125 : f32 to vector<2x128xf32>
    %127 = arith.mulf %12, %126 : vector<2x128xf32>
    %128 = arith.addf %124, %127 : vector<2x128xf32>
    %c18 = arith.constant 18 : index
    %129 = memref.load %arg1[%c18] : memref<48xf32, #tpu.memory_space<smem>>
    %130 = vector.broadcast %129 : f32 to vector<2x128xf32>
    %131 = arith.mulf %13, %130 : vector<2x128xf32>
    %132 = arith.addf %128, %131 : vector<2x128xf32>
    %c19 = arith.constant 19 : index
    %133 = memref.load %arg1[%c19] : memref<48xf32, #tpu.memory_space<smem>>
    %134 = vector.broadcast %133 : f32 to vector<2x128xf32>
    %135 = arith.mulf %14, %134 : vector<2x128xf32>
    %136 = arith.addf %132, %135 : vector<2x128xf32>
    %137 = arith.mulf %136, %136 : vector<2x128xf32>
    %138 = tpu.concatenate %136, %137 in 0 : vector<2x128xf32>, vector<2x128xf32> -> vector<4x128xf32>
    %cst_11 = arith.constant dense<0.000000e+00> : vector<4xf32>
    %139 = vector.multi_reduction <add>, %138, %cst_11 [1] : vector<4x128xf32> to vector<4xf32>
    %140 = vector.shape_cast %139 : vector<4xf32> to vector<4x1xf32>
    %141 = vector.extract_strided_slice %140 {offsets = [0, 0], sizes = [2, 1], strides = [1, 1]} : vector<4x1xf32> to vector<2x1xf32>
    %142 = vector.shape_cast %141 : vector<2x1xf32> to vector<1x2x1xf32>
    %cst_12 = arith.constant dense<0.000000e+00> : vector<1xf32>
    %143 = vector.multi_reduction <add>, %142, %cst_12 [1, 2] : vector<1x2x1xf32> to vector<1xf32>
    %144 = vector.shape_cast %143 : vector<1xf32> to vector<1x1x1xf32>
    %145 = vector.extract %144[0, 0, 0] : f32 from vector<1x1x1xf32>
    %146 = vector.broadcast %145 : f32 to vector<1x1xf32>
    %147 = vector.extract_strided_slice %140 {offsets = [2, 0], sizes = [2, 1], strides = [1, 1]} : vector<4x1xf32> to vector<2x1xf32>
    %148 = vector.shape_cast %147 : vector<2x1xf32> to vector<1x2x1xf32>
    %cst_13 = arith.constant dense<0.000000e+00> : vector<1xf32>
    %149 = vector.multi_reduction <add>, %148, %cst_13 [1, 2] : vector<1x2x1xf32> to vector<1xf32>
    %150 = vector.shape_cast %149 : vector<1xf32> to vector<1x1x1xf32>
    %151 = vector.extract %150[0, 0, 0] : f32 from vector<1x1x1xf32>
    %152 = vector.broadcast %151 : f32 to vector<1x1xf32>
    %cst_14 = arith.constant 3.906250e-03 : f32
    %153 = vector.broadcast %cst_14 : f32 to vector<1x1xf32>
    %154 = arith.mulf %146, %153 : vector<1x1xf32>
    %cst_15 = arith.constant 3.906250e-03 : f32
    %155 = vector.broadcast %cst_15 : f32 to vector<1x1xf32>
    %156 = arith.mulf %152, %155 : vector<1x1xf32>
    %157 = arith.mulf %154, %154 : vector<1x1xf32>
    %158 = arith.subf %156, %157 : vector<1x1xf32>
    %cst_16 = arith.constant 0.000000e+00 : f32
    %159 = vector.broadcast %cst_16 : f32 to vector<1x1xf32>
    %160 = arith.maximumf %158, %159 : vector<1x1xf32>
    %c41 = arith.constant 41 : index
    %161 = memref.load %arg1[%c41] : memref<48xf32, #tpu.memory_space<smem>>
    %cst_17 = arith.constant 9.99999974E-6 : f32
    %162 = vector.broadcast %cst_17 : f32 to vector<1x1xf32>
    %163 = arith.addf %160, %162 : vector<1x1xf32>
    %164 = math.rsqrt %163 : vector<1x1xf32>
    %165 = vector.broadcast %161 : f32 to vector<1x1xf32>
    %166 = arith.mulf %165, %164 : vector<1x1xf32>
    %c45 = arith.constant 45 : index
    %167 = memref.load %arg1[%c45] : memref<48xf32, #tpu.memory_space<smem>>
    %168 = arith.mulf %154, %166 : vector<1x1xf32>
    %169 = vector.broadcast %167 : f32 to vector<1x1xf32>
    %170 = arith.subf %169, %168 : vector<1x1xf32>
    %171 = vector.broadcast %166 : vector<1x1xf32> to vector<2x128xf32>
    %172 = arith.mulf %136, %171 : vector<2x128xf32>
    %173 = vector.broadcast %170 : vector<1x1xf32> to vector<2x128xf32>
    %174 = arith.addf %172, %173 : vector<2x128xf32>
    %cst_18 = arith.constant 1.230000e+02 : f32
    %175 = vector.broadcast %cst_18 : f32 to vector<2x128xf32>
    %176 = arith.maximumf %174, %175 : vector<2x128xf32>
    %cst_19 = arith.constant 4.570000e+02 : f32
    %177 = vector.broadcast %cst_19 : f32 to vector<2x128xf32>
    %178 = arith.minimumf %176, %177 : vector<2x128xf32>
    %179 = vector.extract_strided_slice %178 {offsets = [0, 0], sizes = [1, 128], strides = [1, 1]} : vector<2x128xf32> to vector<1x128xf32>
    %180 = vector.extract_strided_slice %178 {offsets = [1, 0], sizes = [1, 128], strides = [1, 1]} : vector<2x128xf32> to vector<1x128xf32>
    %c20 = arith.constant 20 : index
    %181 = memref.load %arg1[%c20] : memref<48xf32, #tpu.memory_space<smem>>
    %182 = vector.broadcast %181 : f32 to vector<2x128xf32>
    %183 = arith.mulf %3, %182 : vector<2x128xf32>
    %c21 = arith.constant 21 : index
    %184 = memref.load %arg1[%c21] : memref<48xf32, #tpu.memory_space<smem>>
    %185 = vector.broadcast %184 : f32 to vector<2x128xf32>
    %186 = arith.mulf %4, %185 : vector<2x128xf32>
    %187 = arith.addf %183, %186 : vector<2x128xf32>
    %c22 = arith.constant 22 : index
    %188 = memref.load %arg1[%c22] : memref<48xf32, #tpu.memory_space<smem>>
    %189 = vector.broadcast %188 : f32 to vector<2x128xf32>
    %190 = arith.mulf %5, %189 : vector<2x128xf32>
    %191 = arith.addf %187, %190 : vector<2x128xf32>
    %c23 = arith.constant 23 : index
    %192 = memref.load %arg1[%c23] : memref<48xf32, #tpu.memory_space<smem>>
    %193 = vector.broadcast %192 : f32 to vector<2x128xf32>
    %194 = arith.mulf %6, %193 : vector<2x128xf32>
    %195 = arith.addf %191, %194 : vector<2x128xf32>
    %c24 = arith.constant 24 : index
    %196 = memref.load %arg1[%c24] : memref<48xf32, #tpu.memory_space<smem>>
    %197 = vector.broadcast %196 : f32 to vector<2x128xf32>
    %198 = arith.mulf %7, %197 : vector<2x128xf32>
    %199 = arith.addf %195, %198 : vector<2x128xf32>
    %c25 = arith.constant 25 : index
    %200 = memref.load %arg1[%c25] : memref<48xf32, #tpu.memory_space<smem>>
    %201 = vector.broadcast %200 : f32 to vector<2x128xf32>
    %202 = arith.mulf %10, %201 : vector<2x128xf32>
    %203 = arith.addf %199, %202 : vector<2x128xf32>
    %c26 = arith.constant 26 : index
    %204 = memref.load %arg1[%c26] : memref<48xf32, #tpu.memory_space<smem>>
    %205 = vector.broadcast %204 : f32 to vector<2x128xf32>
    %206 = arith.mulf %11, %205 : vector<2x128xf32>
    %207 = arith.addf %203, %206 : vector<2x128xf32>
    %c27 = arith.constant 27 : index
    %208 = memref.load %arg1[%c27] : memref<48xf32, #tpu.memory_space<smem>>
    %209 = vector.broadcast %208 : f32 to vector<2x128xf32>
    %210 = arith.mulf %12, %209 : vector<2x128xf32>
    %211 = arith.addf %207, %210 : vector<2x128xf32>
    %c28 = arith.constant 28 : index
    %212 = memref.load %arg1[%c28] : memref<48xf32, #tpu.memory_space<smem>>
    %213 = vector.broadcast %212 : f32 to vector<2x128xf32>
    %214 = arith.mulf %13, %213 : vector<2x128xf32>
    %215 = arith.addf %211, %214 : vector<2x128xf32>
    %c29 = arith.constant 29 : index
    %216 = memref.load %arg1[%c29] : memref<48xf32, #tpu.memory_space<smem>>
    %217 = vector.broadcast %216 : f32 to vector<2x128xf32>
    %218 = arith.mulf %14, %217 : vector<2x128xf32>
    %219 = arith.addf %215, %218 : vector<2x128xf32>
    %220 = arith.mulf %219, %219 : vector<2x128xf32>
    %221 = tpu.concatenate %219, %220 in 0 : vector<2x128xf32>, vector<2x128xf32> -> vector<4x128xf32>
    %cst_20 = arith.constant dense<0.000000e+00> : vector<4xf32>
    %222 = vector.multi_reduction <add>, %221, %cst_20 [1] : vector<4x128xf32> to vector<4xf32>
    %223 = vector.shape_cast %222 : vector<4xf32> to vector<4x1xf32>
    %224 = vector.extract_strided_slice %223 {offsets = [0, 0], sizes = [2, 1], strides = [1, 1]} : vector<4x1xf32> to vector<2x1xf32>
    %225 = vector.shape_cast %224 : vector<2x1xf32> to vector<1x2x1xf32>
    %cst_21 = arith.constant dense<0.000000e+00> : vector<1xf32>
    %226 = vector.multi_reduction <add>, %225, %cst_21 [1, 2] : vector<1x2x1xf32> to vector<1xf32>
    %227 = vector.shape_cast %226 : vector<1xf32> to vector<1x1x1xf32>
    %228 = vector.extract %227[0, 0, 0] : f32 from vector<1x1x1xf32>
    %229 = vector.broadcast %228 : f32 to vector<1x1xf32>
    %230 = vector.extract_strided_slice %223 {offsets = [2, 0], sizes = [2, 1], strides = [1, 1]} : vector<4x1xf32> to vector<2x1xf32>
    %231 = vector.shape_cast %230 : vector<2x1xf32> to vector<1x2x1xf32>
    %cst_22 = arith.constant dense<0.000000e+00> : vector<1xf32>
    %232 = vector.multi_reduction <add>, %231, %cst_22 [1, 2] : vector<1x2x1xf32> to vector<1xf32>
    %233 = vector.shape_cast %232 : vector<1xf32> to vector<1x1x1xf32>
    %234 = vector.extract %233[0, 0, 0] : f32 from vector<1x1x1xf32>
    %235 = vector.broadcast %234 : f32 to vector<1x1xf32>
    %cst_23 = arith.constant 3.906250e-03 : f32
    %236 = vector.broadcast %cst_23 : f32 to vector<1x1xf32>
    %237 = arith.mulf %229, %236 : vector<1x1xf32>
    %cst_24 = arith.constant 3.906250e-03 : f32
    %238 = vector.broadcast %cst_24 : f32 to vector<1x1xf32>
    %239 = arith.mulf %235, %238 : vector<1x1xf32>
    %240 = arith.mulf %237, %237 : vector<1x1xf32>
    %241 = arith.subf %239, %240 : vector<1x1xf32>
    %cst_25 = arith.constant 0.000000e+00 : f32
    %242 = vector.broadcast %cst_25 : f32 to vector<1x1xf32>
    %243 = arith.maximumf %241, %242 : vector<1x1xf32>
    %c42 = arith.constant 42 : index
    %244 = memref.load %arg1[%c42] : memref<48xf32, #tpu.memory_space<smem>>
    %cst_26 = arith.constant 9.99999974E-6 : f32
    %245 = vector.broadcast %cst_26 : f32 to vector<1x1xf32>
    %246 = arith.addf %243, %245 : vector<1x1xf32>
    %247 = math.rsqrt %246 : vector<1x1xf32>
    %248 = vector.broadcast %244 : f32 to vector<1x1xf32>
    %249 = arith.mulf %248, %247 : vector<1x1xf32>
    %c46 = arith.constant 46 : index
    %250 = memref.load %arg1[%c46] : memref<48xf32, #tpu.memory_space<smem>>
    %251 = arith.mulf %237, %249 : vector<1x1xf32>
    %252 = vector.broadcast %250 : f32 to vector<1x1xf32>
    %253 = arith.subf %252, %251 : vector<1x1xf32>
    %254 = vector.broadcast %249 : vector<1x1xf32> to vector<2x128xf32>
    %255 = arith.mulf %219, %254 : vector<2x128xf32>
    %256 = vector.broadcast %253 : vector<1x1xf32> to vector<2x128xf32>
    %257 = arith.addf %255, %256 : vector<2x128xf32>
    %cst_27 = arith.constant 1.230000e+02 : f32
    %258 = vector.broadcast %cst_27 : f32 to vector<2x128xf32>
    %259 = arith.maximumf %257, %258 : vector<2x128xf32>
    %cst_28 = arith.constant 4.570000e+02 : f32
    %260 = vector.broadcast %cst_28 : f32 to vector<2x128xf32>
    %261 = arith.minimumf %259, %260 : vector<2x128xf32>
    %262 = vector.extract_strided_slice %261 {offsets = [0, 0], sizes = [1, 128], strides = [1, 1]} : vector<2x128xf32> to vector<1x128xf32>
    %263 = vector.extract_strided_slice %261 {offsets = [1, 0], sizes = [1, 128], strides = [1, 1]} : vector<2x128xf32> to vector<1x128xf32>
    %c30 = arith.constant 30 : index
    %264 = memref.load %arg1[%c30] : memref<48xf32, #tpu.memory_space<smem>>
    %265 = vector.broadcast %264 : f32 to vector<2x128xf32>
    %266 = arith.mulf %3, %265 : vector<2x128xf32>
    %c31 = arith.constant 31 : index
    %267 = memref.load %arg1[%c31] : memref<48xf32, #tpu.memory_space<smem>>
    %268 = vector.broadcast %267 : f32 to vector<2x128xf32>
    %269 = arith.mulf %4, %268 : vector<2x128xf32>
    %270 = arith.addf %266, %269 : vector<2x128xf32>
    %c32 = arith.constant 32 : index
    %271 = memref.load %arg1[%c32] : memref<48xf32, #tpu.memory_space<smem>>
    %272 = vector.broadcast %271 : f32 to vector<2x128xf32>
    %273 = arith.mulf %5, %272 : vector<2x128xf32>
    %274 = arith.addf %270, %273 : vector<2x128xf32>
    %c33 = arith.constant 33 : index
    %275 = memref.load %arg1[%c33] : memref<48xf32, #tpu.memory_space<smem>>
    %276 = vector.broadcast %275 : f32 to vector<2x128xf32>
    %277 = arith.mulf %6, %276 : vector<2x128xf32>
    %278 = arith.addf %274, %277 : vector<2x128xf32>
    %c34 = arith.constant 34 : index
    %279 = memref.load %arg1[%c34] : memref<48xf32, #tpu.memory_space<smem>>
    %280 = vector.broadcast %279 : f32 to vector<2x128xf32>
    %281 = arith.mulf %7, %280 : vector<2x128xf32>
    %282 = arith.addf %278, %281 : vector<2x128xf32>
    %c35 = arith.constant 35 : index
    %283 = memref.load %arg1[%c35] : memref<48xf32, #tpu.memory_space<smem>>
    %284 = vector.broadcast %283 : f32 to vector<2x128xf32>
    %285 = arith.mulf %10, %284 : vector<2x128xf32>
    %286 = arith.addf %282, %285 : vector<2x128xf32>
    %c36 = arith.constant 36 : index
    %287 = memref.load %arg1[%c36] : memref<48xf32, #tpu.memory_space<smem>>
    %288 = vector.broadcast %287 : f32 to vector<2x128xf32>
    %289 = arith.mulf %11, %288 : vector<2x128xf32>
    %290 = arith.addf %286, %289 : vector<2x128xf32>
    %c37 = arith.constant 37 : index
    %291 = memref.load %arg1[%c37] : memref<48xf32, #tpu.memory_space<smem>>
    %292 = vector.broadcast %291 : f32 to vector<2x128xf32>
    %293 = arith.mulf %12, %292 : vector<2x128xf32>
    %294 = arith.addf %290, %293 : vector<2x128xf32>
    %c38 = arith.constant 38 : index
    %295 = memref.load %arg1[%c38] : memref<48xf32, #tpu.memory_space<smem>>
    %296 = vector.broadcast %295 : f32 to vector<2x128xf32>
    %297 = arith.mulf %13, %296 : vector<2x128xf32>
    %298 = arith.addf %294, %297 : vector<2x128xf32>
    %c39 = arith.constant 39 : index
    %299 = memref.load %arg1[%c39] : memref<48xf32, #tpu.memory_space<smem>>
    %300 = vector.broadcast %299 : f32 to vector<2x128xf32>
    %301 = arith.mulf %14, %300 : vector<2x128xf32>
    %302 = arith.addf %298, %301 : vector<2x128xf32>
    %303 = arith.mulf %302, %302 : vector<2x128xf32>
    %304 = tpu.concatenate %302, %303 in 0 : vector<2x128xf32>, vector<2x128xf32> -> vector<4x128xf32>
    %cst_29 = arith.constant dense<0.000000e+00> : vector<4xf32>
    %305 = vector.multi_reduction <add>, %304, %cst_29 [1] : vector<4x128xf32> to vector<4xf32>
    %306 = vector.shape_cast %305 : vector<4xf32> to vector<4x1xf32>
    %307 = vector.extract_strided_slice %306 {offsets = [0, 0], sizes = [2, 1], strides = [1, 1]} : vector<4x1xf32> to vector<2x1xf32>
    %308 = vector.shape_cast %307 : vector<2x1xf32> to vector<1x2x1xf32>
    %cst_30 = arith.constant dense<0.000000e+00> : vector<1xf32>
    %309 = vector.multi_reduction <add>, %308, %cst_30 [1, 2] : vector<1x2x1xf32> to vector<1xf32>
    %310 = vector.shape_cast %309 : vector<1xf32> to vector<1x1x1xf32>
    %311 = vector.extract %310[0, 0, 0] : f32 from vector<1x1x1xf32>
    %312 = vector.broadcast %311 : f32 to vector<1x1xf32>
    %313 = vector.extract_strided_slice %306 {offsets = [2, 0], sizes = [2, 1], strides = [1, 1]} : vector<4x1xf32> to vector<2x1xf32>
    %314 = vector.shape_cast %313 : vector<2x1xf32> to vector<1x2x1xf32>
    %cst_31 = arith.constant dense<0.000000e+00> : vector<1xf32>
    %315 = vector.multi_reduction <add>, %314, %cst_31 [1, 2] : vector<1x2x1xf32> to vector<1xf32>
    %316 = vector.shape_cast %315 : vector<1xf32> to vector<1x1x1xf32>
    %317 = vector.extract %316[0, 0, 0] : f32 from vector<1x1x1xf32>
    %318 = vector.broadcast %317 : f32 to vector<1x1xf32>
    %cst_32 = arith.constant 3.906250e-03 : f32
    %319 = vector.broadcast %cst_32 : f32 to vector<1x1xf32>
    %320 = arith.mulf %312, %319 : vector<1x1xf32>
    %cst_33 = arith.constant 3.906250e-03 : f32
    %321 = vector.broadcast %cst_33 : f32 to vector<1x1xf32>
    %322 = arith.mulf %318, %321 : vector<1x1xf32>
    %323 = arith.mulf %320, %320 : vector<1x1xf32>
    %324 = arith.subf %322, %323 : vector<1x1xf32>
    %cst_34 = arith.constant 0.000000e+00 : f32
    %325 = vector.broadcast %cst_34 : f32 to vector<1x1xf32>
    %326 = arith.maximumf %324, %325 : vector<1x1xf32>
    %c43 = arith.constant 43 : index
    %327 = memref.load %arg1[%c43] : memref<48xf32, #tpu.memory_space<smem>>
    %cst_35 = arith.constant 9.99999974E-6 : f32
    %328 = vector.broadcast %cst_35 : f32 to vector<1x1xf32>
    %329 = arith.addf %326, %328 : vector<1x1xf32>
    %330 = math.rsqrt %329 : vector<1x1xf32>
    %331 = vector.broadcast %327 : f32 to vector<1x1xf32>
    %332 = arith.mulf %331, %330 : vector<1x1xf32>
    %c47 = arith.constant 47 : index
    %333 = memref.load %arg1[%c47] : memref<48xf32, #tpu.memory_space<smem>>
    %334 = arith.mulf %320, %332 : vector<1x1xf32>
    %335 = vector.broadcast %333 : f32 to vector<1x1xf32>
    %336 = arith.subf %335, %334 : vector<1x1xf32>
    %337 = vector.broadcast %332 : vector<1x1xf32> to vector<2x128xf32>
    %338 = arith.mulf %302, %337 : vector<2x128xf32>
    %339 = vector.broadcast %336 : vector<1x1xf32> to vector<2x128xf32>
    %340 = arith.addf %338, %339 : vector<2x128xf32>
    %cst_36 = arith.constant 1.230000e+02 : f32
    %341 = vector.broadcast %cst_36 : f32 to vector<2x128xf32>
    %342 = arith.maximumf %340, %341 : vector<2x128xf32>
    %cst_37 = arith.constant 4.570000e+02 : f32
    %343 = vector.broadcast %cst_37 : f32 to vector<2x128xf32>
    %344 = arith.minimumf %342, %343 : vector<2x128xf32>
    %345 = vector.extract_strided_slice %344 {offsets = [0, 0], sizes = [1, 128], strides = [1, 1]} : vector<2x128xf32> to vector<1x128xf32>
    %346 = vector.extract_strided_slice %344 {offsets = [1, 0], sizes = [1, 128], strides = [1, 1]} : vector<2x128xf32> to vector<1x128xf32>
    %347 = tpu.concatenate %96, %179, %262, %345, %97, %180, %263, %346 in 0 : vector<1x128xf32>, vector<1x128xf32>, vector<1x128xf32>, vector<1x128xf32>, vector<1x128xf32>, vector<1x128xf32>, vector<1x128xf32>, vector<1x128xf32> -> vector<8x128xf32>
    %c0_38 = arith.constant 0 : index
    %c0_39 = arith.constant 0 : index
    %348 = vector.load %arg2[%c0_38, %c0_39] : memref<8x128xf32, #tpu.memory_space<vmem>>, vector<8x128xf32>
    tpu.vector_store %arg2[%c0_38, %c0_39], %347 {strides = array<i32>} : memref<8x128xf32, #tpu.memory_space<vmem>>, vector<8x128xf32>,
    return
  }
}

</mosaic_0001>

<bundles_post_ra>
// kernel: tpu_custom_call.1
= control target key start
LH: loop header
LB: loop body
LE: loop exit
PB: predicated region body
PF: predicated region fallthrough
CT: control target
= control target key end

     0   :  { %7 = vsyncpa [#allocation3], 0  ;;  %s1826_s0 = inlined_call_operand.hbm [shape: f32[2,2,132], index: 0, kind: input, shape index: {}]   ;;  %s1827_s1 = inlined_call_operand.hbm [shape: f32[48], index: 1, kind: input, shape index: {}]   ;;  %s1828_s2 = inlined_call_operand.hbm [shape: f32[8,128], index: 2, kind: output, shape index: {}]  }
   0x1   :  { %8 = vsyncpa [#allocation5], 0 }
   0x2   :  { %9 = vsyncpa [#allocation4], 0  ;;  %s14_s11 = sshll.u32 %s1826_s0, 4  ;;  %s1298_s12 = smov [#allocation2]   ;;  %s15_s11 = int_to_ptr.hbm [resolvable:$true] %s14_s11 }
   0x3   :  { %s16_s13 = sshll.u32 %s1298_s12, 4  ;;  %s28_s16 = sshll.u32 %s1827_s1, 4  ;;  %s17_s13 = int_to_ptr.vmem [resolvable:$true] %s16_s13  ;;  %s29_s16 = int_to_ptr.hbm [resolvable:$true] %s28_s16 }
   0x4   :  { %s1299_s17 = smov 64   ;;  %s1300_s18 = smov 4  }
   0x5   :  { %22 = dma.hbm_to_vmem [thread:$0]  %s15_s11, 128, %s17_s13, [#allocation3], %s1299_s17, %s1299_s17, %s1300_s18  }
   0x6   :  { %s1301_s19 = smov [#allocation6]  }
   0x7   :  { %31 = dma.hbm_to_smem %s29_s16, 16, %s1301_s19, [#allocation5]  }
   0x8   :  { %1292 = dma.done.wait [#allocation3], 128  }
   0x9   :  { %1293 = vsyncadd [#allocation3], 4294967168 }
   0xa   :  { %1294 = dma.done.wait [#allocation5], 16  }
   0xb   :  { %1295 = vsyncadd [#allocation5], 4294967280 }
   0xc   :  { %40 = sfence }
   0xd   :  { %s1114_s0 = sld [smem:[#allocation6 + $0x3]]  ;;  %v1328_v0 = vld [vmem:[#allocation2] sm:$0xf]  ;;  %s1302_s1 = smov 125   ;;  %v1334_v7 = vld [vmem:[#allocation2 + $0x4] sm:$0xf] }
   0xe   :  { %s1113_s20 = sld [smem:[#allocation6 + $0x2]]  ;;  %s1303_s22 = smov 126   ;;  %vm59_vm0 = vcmask 1039360   ;;  %vm78_vm1 = vcmask 1031168   ;;  %vm97_vm2 = vcmask 1022976   ;;  %vm116_vm3 = vcmask 1014784  }
   0xf   :  { %s1112_s21 = sld [smem:[#allocation6 + $0x1]]  ;;  %s1304_s24 = smov 127   ;;  %vm231_vm4 = vcmask 1041409   ;;  %vm238_vm5 = vcmask 1043459   ;;  %vm241_vm6 = vcmask 1041408   ;;  %vm243_vm7 = vcmask 1043456  }
  0x10   :  { %s1134_s23 = sld [smem:[#allocation6 + $0xb]]  ;;  %s1305_s27 = smov 124   ;;  %vm247_vm8 = vcmask 1024  }
  0x11   :  { %s1115_s25 = sld [smem:[#allocation6 + $0x4]] }
  0x12   :  { %s1156_s26 = sld [smem:[#allocation6 + $0x15]] }
  0x13   :  { %v86_v1 = vstv %s1114_s0  ;;  %s1157_s28 = sld [smem:[#allocation6 + $0x16]] }
  0x14   :  { %v87_v2 = vmul.f32 %v86_v1, %v1328_v0  ;;  %v67_v3 = vstv %s1113_s20  ;;  %v88_v8 = vmul.f32 %v86_v1, %v1334_v7  ;;  %s1135_s29 = sld [smem:[#allocation6 + $0xc]] }
  0x15   :  { %v68_v4 = vmul.f32 %v67_v3, %v1328_v0  ;;  %v48_v5 = vstv %s1112_s21  ;;  %v69_v9 = vmul.f32 %v67_v3, %v1334_v7  ;;  %s1178_s30 = sld [smem:[#allocation6 + $0x1f]] }
  0x16   :  { %91 = vrot.lane.b32.xlu2 %v87_v2, %s1302_s1  ;;  %v49_v6 = vmul.f32 %v48_v5, %v1328_v0  ;;  %v50_v10 = vmul.f32 %v48_v5, %v1334_v7  ;;  %v309_v11 = vstv %s1134_s23  ;;  %s1158_s3 = sld [smem:[#allocation6 + $0x17]] }
  0x17   :  { %72 = vrot.lane.b32.xlu1 %v68_v4, %s1303_s22  ;;  %v105_v12 = vstv %s1115_s25  ;;  %v310_v13 = vmul.f32 %v309_v11, %v1328_v0  ;;  %v311_v19 = vmul.f32 %v309_v11, %v1334_v7  ;;  %s1136_s4 = sld [smem:[#allocation6 + $0xd]] }
  0x18   :  { %53 = vrot.lane.b32.xlu0 %v49_v6, %s1304_s24  ;;  %v107_v14 = vmul.f32 %v105_v12, %v1334_v7  ;;  %v106_v15 = vmul.f32 %v105_v12, %v1328_v0  ;;  %v561_v16 = vstv %s1156_s26  ;;  %s1179_s5 = sld [smem:[#allocation6 + $0x20]] }
  0x19   :  { %v563_v17 = vmul.f32 %v561_v16, %v1334_v7  ;;  %v562_v18 = vmul.f32 %v561_v16, %v1328_v0  ;;  %v579_v20 = vstv %s1157_s28  ;;  %s1159_s6 = sld [smem:[#allocation6 + $0x18]] }
  0x1a   :  { %v327_v21 = vstv %s1135_s29  ;;  %v580_v22 = vmul.f32 %v579_v20, %v1328_v0  ;;  %v581_v28 = vmul.f32 %v579_v20, %v1334_v7  ;;  %s1137_s7 = sld [smem:[#allocation6 + $0xe]] }
  0x1b   :  { %v329_v23 = vmul.f32 %v327_v21, %v1334_v7  ;;  %v328_v24 = vmul.f32 %v327_v21, %v1328_v0  ;;  %v813_v25 = vstv %s1178_s30  ;;  %s1180_s8 = sld [smem:[#allocation6 + $0x21]] }
  0x1c   :  { %v815_v26 = vmul.f32 %v813_v25, %v1334_v7  ;;  %v814_v27 = vmul.f32 %v813_v25, %v1328_v0  ;;  %v597_v29 = vstv %s1158_s3  ;;  %s1119_s9 = sld [smem:[#allocation6 + $0x6]] }
  0x1d   :  { %v345_v30 = vstv %s1136_s4  ;;  %v598_v31 = vmul.f32 %v597_v29, %v1328_v0  ;;  %v599_v37 = vmul.f32 %v597_v29, %v1334_v7  ;;  %s1181_s10 = sld [smem:[#allocation6 + $0x22]] }
  0x1e   :  { %93 = vrot.lane.b32.xlu2 %v88_v8, %s1302_s1  ;;  %v347_v32 = vmul.f32 %v345_v30, %v1334_v7  ;;  %v346_v33 = vmul.f32 %v345_v30, %v1328_v0  ;;  %v831_v34 = vstv %s1179_s5  ;;  %s1141_s11 = sld [smem:[#allocation6 + $0x10]] }
  0x1f   :  { %74 = vrot.lane.b32.xlu1 %v69_v9, %s1303_s22  ;;  %v833_v35 = vmul.f32 %v831_v34, %v1334_v7  ;;  %v832_v36 = vmul.f32 %v831_v34, %v1328_v0  ;;  %v615_v38 = vstv %s1159_s6  ;;  %s1395_s12 = sld [smem:[#allocation6 + $0x1a]] }
  0x20   :  { %55 = vrot.lane.b32.xlu0 %v50_v10, %s1304_s24  ;;  %v363_v39 = vstv %s1137_s7  ;;  %v616_v40 = vmul.f32 %v615_v38, %v1328_v0  ;;  %v617_v46 = vmul.f32 %v615_v38, %v1334_v7  ;;  %s1122_s13 = sld [smem:[#allocation6 + $0x7]] }
  0x21   :  { %v365_v41 = vmul.f32 %v363_v39, %v1334_v7  ;;  %v364_v42 = vmul.f32 %v363_v39, %v1328_v0  ;;  %v849_v43 = vstv %s1180_s8  ;;  %s1144_s14 = sld [smem:[#allocation6 + $0x11]] }
  0x22   :  { %v851_v44 = vmul.f32 %v849_v43, %v1334_v7  ;;  %v850_v45 = vmul.f32 %v849_v43, %v1328_v0  ;;  %v138_v47 = vstv %s1119_s9  ;;  %s1412_s15 = sld [smem:[#allocation6 + $0x1b]] }
  0x23   :  { %v867_v48 = vstv %s1181_s10  ;;  %v140_v49 = vmul.f32 %v138_v47, %v1334_v7  ;;  %v139_v50 = vmul.f32 %v138_v47, %v1328_v0  ;;  %s1125_s16 = sld [smem:[#allocation6 + $0x8]] }
  0x24   :  { %v868_v51 = vmul.f32 %v867_v48, %v1328_v0  ;;  %v395_v53 = vstv %s1141_s11  ;;  %v869_v60 = vmul.f32 %v867_v48, %v1334_v7  ;;  %s1185_s17 = sld [smem:[#allocation6 + $0x24]] }
  0x25   :  { %v1121_v52 = vrot.slane %v140_v49, 9  ;;  %v1120_v54 = vrot.slane %v139_v50, 9  ;;  %v397_v55 = vmul.f32 %v395_v53, %v1334_v7  ;;  %v396_v56 = vmul.f32 %v395_v53, %v1328_v0  ;;  %s1427_s18 = sld [smem:[#allocation6]] }
  0x26   :  { %314 = vrot.lane.b32.xlu2 %v310_v13, %s1304_s24  ;;  %v647_v59 = vstv %s1395_s12  ;;  %v160_v61 = vstv %s1122_s13  ;;  %s1433_s19 = sld [smem:[#allocation6 + $0x9]] }
  0x27   :  { %112 = vrot.lane.b32.xlu1 %v107_v14, %s1305_s27  ;;  %v1143_v57 = vrot.slane %v397_v55, 9  ;;  %v1142_v58 = vrot.slane %v396_v56, 9  ;;  %v648_v62 = vmul.f32 %v647_v59, %v1328_v0  ;;  %v162_v63 = vmul.f32 %v160_v61, %v1334_v7  ;;  %s1435_s0 = sld [smem:[#allocation6 + $0x12]] }
  0x28   :  { %110 = vrot.lane.b32.xlu0 %v106_v15, %s1305_s27  ;;  %v161_v2 = vmul.f32 %v160_v61, %v1328_v0  ;;  %v417_v5 = vstv %s1144_s14  ;;  %v649_v11 = vmul.f32 %v647_v59, %v1334_v7  ;;  %v669_v14 = vstv %s1412_s15  ;;  %s1448_s20 = sld [smem:[#allocation6 + $0x1c]] }
  0x29   :  { %v1164_v3 = vrot.slane %v648_v62, 9  ;;  %v1124_v4 = vrot.slane %v162_v63, 9  ;;  %v419_v8 = vmul.f32 %v417_v5, %v1334_v7  ;;  %v418_v9 = vmul.f32 %v417_v5, %v1328_v0  ;;  %s1466_s21 = sld [smem:[#allocation6 + $0x13]] }
  0x2a   :  { %v1123_v6 = vrot.slane %v161_v2, 9  ;;  %v1165_v15 = vrot.slane %v649_v11, 9  ;;  %v182_v16 = vstv %s1125_s16  ;;  %v671_v29 = vmul.f32 %v669_v14, %v1334_v7  ;;  %s1468_s23 = sld [smem:[#allocation6 + $0x25]] }
  0x2b   :  { %v1146_v12 = vrot.slane %v419_v8, 9  ;;  %v1145_v13 = vrot.slane %v418_v9, 9  ;;  %v183_v20 = vmul.f32 %v182_v16, %v1328_v0  ;;  %s1480_s25 = sld [smem:[#allocation6 + $0x1e]] }
  0x2c   :  { %v1168_v38 = vrot.slane %v671_v29, 9  ;;  %s1485_s26 = sld [smem:[#allocation6 + $0xa]] }
  0x2d   :  { %v439_v39 = vstv %s1435_s0  ;;  %s1488_s28 = sld [smem:[#allocation6 + $0x1d]]  ;;  %s1306_s0 = smov [#allocation7]  }
  0x2e   :  { %568 = vrot.lane.b32.xlu2 %v563_v17, %s1304_s24  ;;  %v670_v17 = vmul.f32 %v669_v14, %v1328_v0  ;;  %v440_v48 = vmul.f32 %v439_v39, %v1328_v0  ;;  %s1518_s29 = sld [smem:[#allocation6 + $0x26]] }
  0x2f   :  { %566 = vrot.lane.b32.xlu1 %v562_v18, %s1304_s24  ;;  %v184_v18 = vmul.f32 %v182_v16, %v1334_v7  ;;  %v461_v16 = vstv %s1466_s21  ;;  %s1521_s30 = sld [smem:[#allocation6 + $0x27]] }
  0x30   :  { %316 = vrot.lane.b32.xlu0 %v311_v19, %s1304_s24  ;;  %v1167_v21 = vrot.slane %v670_v17, 9  ;;  %v1148_v59 = vrot.slane %v440_v48, 9  ;;  %s1619_s3 = sld [smem:[#allocation6 + $0x23]] }
  0x31   :  { %s1785_s12 = sld [smem:[#allocation6 + $0x28]] }
  0x32   :  { %s1787_s13 = sld [smem:[#allocation6 + $0x29]] }
  0x33   :  { %s1789_s14 = sld [smem:[#allocation6 + $0x2a]] }
  0x34   :  { %s1791_s15 = sld [smem:[#allocation6 + $0x2d]] }
  0x35   :  { %s1794_s16 = sld [smem:[#allocation6 + $0x2c]] }
  0x36   :  { %584 = vrot.lane.b32.xlu2 %v580_v22, %s1303_s22  ;;  %v1127_v22 = vrot.slane %v184_v18, 9 }
  0x37   :  { %334 = vrot.lane.b32.xlu1 %v329_v23, %s1303_s22  ;;  %v899_v23 = vstv %s1185_s17  ;;  %s1796_s17 = sld [smem:[#allocation6 + $0x2e]] }
  0x38   :  { %332 = vrot.lane.b32.xlu0 %v328_v24, %s1303_s22  ;;  %v1126_v24 = vrot.slane %v183_v20, 9  ;;  %v901_v25 = vmul.f32 %v899_v23, %v1334_v7 }
  0x3e   :  { %820 = vrot.lane.b32.xlu2 %v815_v26, %s1304_s24  ;;  %v44_v26 = vstv %s1427_s18  ;;  %s1799_s18 = sld [smem:[#allocation6 + $0x2b]] }
  0x3f   :  { %818 = vrot.lane.b32.xlu1 %v814_v27, %s1304_s24  ;;  %v900_v27 = vmul.f32 %v899_v23, %v1328_v0 }
  0x40   :  { %586 = vrot.lane.b32.xlu0 %v581_v28, %s1303_s22 }
  0x46   :  { %602 = vrot.lane.b32.xlu2 %v598_v31, %s1302_s1 }
  0x47   :  { %352 = vrot.lane.b32.xlu1 %v347_v32, %s1302_s1  ;;  %v45_v32 = vmul.f32 %v44_v26, %v1328_v0 }
  0x48   :  { %350 = vrot.lane.b32.xlu0 %v346_v33, %s1302_s1  ;;  %v1187_v33 = vrot.slane %v901_v25, 9 }
  0x4e   :  { %838 = vrot.lane.b32.xlu2 %v833_v35, %s1303_s22 }
  0x4f   :  { %836 = vrot.lane.b32.xlu1 %v832_v36, %s1303_s22  ;;  %v1186_v36 = vrot.slane %v900_v27, 9  ;;  %v809_v27 = vstv %s1480_s25 }
  0x50   :  { %604 = vrot.lane.b32.xlu0 %v599_v37, %s1302_s1  ;;  %v204_v37 = vstv %s1433_s19  ;;  %s1806_s19 = sld [smem:[#allocation6 + $0x2f]] }
  0x51   :  { %v205_v43 = vmul.f32 %v204_v37, %v1328_v0  ;;  %v206_v5 = vmul.f32 %v204_v37, %v1334_v7 }
  0x53   :  { %v1129_v53 = vrot.slane %v205_v43, 9  ;;  %v1130_v18 = vrot.slane %v206_v5, 9 }
  0x56   :  { %620 = vrot.lane.b32.xlu2 %v616_v40, %s1305_s27 }
  0x57   :  { %370 = vrot.lane.b32.xlu1 %v365_v41, %s1305_s27 }
  0x58   :  { %368 = vrot.lane.b32.xlu0 %v364_v42, %s1305_s27 }
  0x5e   :  { %856 = vrot.lane.b32.xlu2 %v851_v44, %s1302_s1 }
  0x5f   :  { %854 = vrot.lane.b32.xlu1 %v850_v45, %s1302_s1  ;;  %v441_v45 = vmul.f32 %v439_v39, %v1334_v7 }
  0x60   :  { %622 = vrot.lane.b32.xlu0 %v617_v46, %s1305_s27 }
  0x66   :  { %872 = vrot.lane.b32.xlu2 %v868_v51, %s1305_s27  ;;  %v46_v51 = vmul.f32 %v44_v26, %v1334_v7 }
  0x67   :  { %149 = vrot.lane.b32.xlu1 %v1121_v52, %s1304_s24 }
  0x68   :  { %147 = vrot.lane.b32.xlu0 %v1120_v54, %s1304_s24 }
  0x6e   :  { %406 = vrot.lane.b32.xlu2 %v1143_v57, %s1304_s24  ;;  %v1149_v57 = vrot.slane %v441_v45, 9 }
  0x6f   :  { %404 = vrot.lane.b32.xlu1 %v1142_v58, %s1304_s24  ;;  %v691_v58 = vstv %s1448_s20  ;;  %s1099_s20 = sshll.u32 %s1306_s0, 4  ;;  %s1100_s20 = int_to_ptr.vmem [resolvable:$true] %s1099_s20 }
  0x70   :  { %874 = vrot.lane.b32.xlu0 %v869_v60, %s1305_s27  ;;  %v1409_v1 = vpop.permute.xlu2 %91  ;;  %v693_v63 = vmul.f32 %v691_v58, %v1334_v7  ;;  %v692_v2 = vmul.f32 %v691_v58, %v1328_v0 }
  0x71   :  { %v95_v40 = vrot.slane %v1409_v1, 2 }
  0x73   :  { %v98_v49 = vsel %vm97_vm2, %v1409_v1, %v95_v40  ;;  %v811_v40 = vmul.f32 %v809_v27, %v1334_v7 }
  0x76   :  { %656 = vrot.lane.b32.xlu2 %v1164_v3, %s1304_s24 }
  0x77   :  { %171 = vrot.lane.b32.xlu1 %v1124_v4, %s1303_s22 }
  0x78   :  { %169 = vrot.lane.b32.xlu0 %v1123_v6, %s1303_s22  ;;  %v1419_v10 = vpop.permute.xlu2 %93 }
  0x79   :  { %v96_v60 = vrot.slane %v1419_v10, 2 }
  0x7b   :  { %v99_v6 = vsel %vm97_vm2, %v1419_v10, %v96_v60  ;;  %v921_v10 = vstv %s1468_s23 }
  0x7c   :  { %v923_v25 = vmul.f32 %v921_v10, %v1334_v7 }
  0x7e   :  { %428 = vrot.lane.b32.xlu2 %v1146_v12, %s1303_s22 }
  0x7f   :  { %426 = vrot.lane.b32.xlu1 %v1145_v13, %s1303_s22  ;;  %v1171_v13 = vrot.slane %v693_v63, 9 }
  0x80   :  { %658 = vrot.lane.b32.xlu0 %v1165_v15, %s1304_s24  ;;  %v1430_v19 = vpop.permute.xlu2 %314  ;;  %v1170_v15 = vrot.slane %v692_v2, 9 }
  0x81   :  { %v318_v39 = vrot.slane %v1430_v19, 2 }
  0x86   :  { %678 = vrot.lane.b32.xlu2 %v1167_v21, %s1303_s22 }
  0x87   :  { %193 = vrot.lane.b32.xlu1 %v1127_v22, %s1302_s1 }
  0x88   :  { %191 = vrot.lane.b32.xlu0 %v1126_v24, %s1302_s1  ;;  %v1443_v28 = vpop.permute.xlu2 %568  ;;  %v462_v24 = vmul.f32 %v461_v16, %v1328_v0 }
  0x89   :  { %v73_v30 = vpop.permute.xlu1 %72 }
  0x8a   :  { %v54_v31 = vpop.permute.xlu0 %53  ;;  %v76_v34 = vrot.slane %v73_v30, 2 }
  0x8b   :  { %v57_v35 = vrot.slane %v54_v31, 2 }
  0x8c   :  { %v79_v44 = vsel %vm78_vm1, %v73_v30, %v76_v34  ;;  %v922_v30 = vmul.f32 %v921_v10, %v1328_v0  ;;  %v305_v34 = vstv %s1485_s26 }
  0x8d   :  { %v60_v41 = vsel %vm59_vm0, %v54_v31, %v57_v35 }
  0x8e   :  { %v64_v42 = vadd.f32 %v60_v41, %v45_v32  ;;  %910 = vrot.lane.b32.xlu2 %v1187_v33, %s1304_s24  ;;  %v1190_v41 = vrot.slane %v923_v25, 9 }
  0x8f   :  { %908 = vrot.lane.b32.xlu1 %v1186_v36, %s1304_s24  ;;  %s1472_s24 = sld [smem:[#allocation6 + $0x14]] }
  0x90   :  { %v83_v46 = vadd.f32 %v79_v44, %v64_v42  ;;  %680 = vrot.lane.b32.xlu0 %v1168_v38, %s1303_s22  ;;  %v1459_v47 = vpop.permute.xlu2 %584  ;;  %v1151_v38 = vrot.slane %v462_v24, 9  ;;  %v713_v42 = vstv %s1488_s28 }
  0x91   :  { %v75_v50 = vpop.permute.xlu1 %74  ;;  %v588_v26 = vrot.slane %v1459_v47, 2 }
  0x92   :  { %v56_v52 = vpop.permute.xlu0 %55  ;;  %v102_v54 = vadd.f32 %v98_v49, %v83_v46  ;;  %v77_v55 = vrot.slane %v75_v50, 2  ;;  %v1189_v46 = vrot.slane %v922_v30, 9 }
  0x93   :  { %v58_v56 = vrot.slane %v56_v52, 2  ;;  %v590_v43 = vsel %vm78_vm1, %v1459_v47, %v588_v26  ;;  %v320_v47 = vsel %vm59_vm0, %v1430_v19, %v318_v39 }
  0x94   :  { %v80_v1 = vsel %vm78_vm1, %v75_v50, %v77_v55  ;;  %v306_v50 = vmul.f32 %v305_v34, %v1328_v0  ;;  %v714_v55 = vmul.f32 %v713_v42, %v1328_v0 }
  0x95   :  { %v61_v61 = vsel %vm59_vm0, %v56_v52, %v58_v56  ;;  %v557_v22 = vstv %s1472_s24  ;;  %v715_v52 = vmul.f32 %v713_v42, %v1334_v7  ;;  %s1101_s24 = sshll.u32 %s1828_s2, 4  ;;  %s1102_s24 = int_to_ptr.hbm [resolvable:$true] %s1101_s24 }
  0x96   :  { %v65_v62 = vadd.f32 %v61_v61, %v46_v51  ;;  %213 = vrot.lane.b32.xlu2 %v1129_v53, %s1305_s27  ;;  %v558_v32 = vmul.f32 %v557_v22, %v1328_v0  ;;  %v324_v19 = vadd.f32 %v320_v47, %v306_v50 }
  0x97   :  { %450 = vrot.lane.b32.xlu1 %v1149_v57, %s1302_s1  ;;  %v1174_v2 = vrot.slane %v715_v52, 9 }
  0x98   :  { %v84_v3 = vadd.f32 %v80_v1, %v65_v62  ;;  %448 = vrot.lane.b32.xlu0 %v1148_v59, %s1302_s1  ;;  %v821_v4 = vpop.permute.xlu2 %820  ;;  %v463_v59 = vmul.f32 %v461_v16, %v1334_v7  ;;  %v965_v16 = vstv %s1521_s30 }
  0x99   :  { %v113_v8 = vpop.permute.xlu1 %112  ;;  %v823_v31 = vrot.slane %v821_v4, 2 }
  0x9a   :  { %v103_v9 = vadd.f32 %v99_v6, %v84_v3  ;;  %v115_v11 = vrot.slane %v113_v8, 2  ;;  %v111_v12 = vpop.permute.xlu0 %110  ;;  %v1173_v6 = vrot.slane %v714_v55, 9 }
  0x9b   :  { %v114_v14 = vrot.slane %v111_v12, 2  ;;  %v825_v48 = vsel %vm59_vm0, %v821_v4, %v823_v31 }
  0x9c   :  { %v118_v17 = vsel %vm116_vm3, %v113_v8, %v115_v11  ;;  %v829_v56 = vadd.f32 %v825_v48, %v811_v40  ;;  %v1152_v11 = vrot.slane %v463_v59, 9  ;;  %v967_v40 = vmul.f32 %v965_v16, %v1334_v7 }
  0x9d   :  { %v1492_v20 = vadd.f32 %v118_v17, %v103_v9  ;;  %v117_v21 = vsel %vm116_vm3, %v111_v12, %v114_v14  ;;  %v943_v12 = vstv %s1518_s29 }
  0x9e   :  { %v1496_v23 = vadd.f32 %v117_v21, %v102_v54  ;;  %702 = vrot.lane.b32.xlu2 %v1171_v13, %s1302_s1  ;;  %v307_v54 = vmul.f32 %v305_v34, %v1334_v7  ;;  %v571_v13 = vrot.slane %v1443_v28, 2  ;;  %v945_v10 = vmul.f32 %v943_v12, %v1334_v7 }
  0x9f   :  { %700 = vrot.lane.b32.xlu1 %v1170_v15, %s1302_s1  ;;  %v559_v21 = vmul.f32 %v557_v22, %v1334_v7  ;;  %v944_v25 = vmul.f32 %v943_v12, %v1328_v0 }
  0xa0   :  { %215 = vrot.lane.b32.xlu0 %v1130_v18, %s1305_s27  ;;  %v603_v29 = vpop.permute.xlu2 %602  ;;  %v966_v18 = vmul.f32 %v965_v16, %v1328_v0  ;;  %v573_v26 = vsel %vm59_vm0, %v1443_v28, %v571_v13 }
  0xa1   :  { %v567_v33 = vpop.permute.xlu1 %566  ;;  %v606_v35 = vrot.slane %v603_v29, 2  ;;  %v1192_v22 = vrot.slane %v944_v25, 9 }
  0xa2   :  { %v570_v36 = vrot.slane %v567_v33, 2  ;;  %v317_v37 = vpop.permute.xlu0 %316 }
  0xa3   :  { %v319_v45 = vrot.slane %v317_v37, 2  ;;  %v608_v51 = vsel %vm97_vm2, %v603_v29, %v606_v35  ;;  %v1193_v35 = vrot.slane %v945_v10, 9 }
  0xa4   :  { %v572_v44 = vsel %vm59_vm0, %v567_v33, %v570_v36  ;;  %v577_v36 = vadd.f32 %v573_v26, %v559_v21 }
  0xa5   :  { %v576_v49 = vadd.f32 %v572_v44, %v558_v32  ;;  %v321_v57 = vsel %vm59_vm0, %v317_v37, %v319_v45  ;;  %v1195_v32 = vrot.slane %v966_v18, 9 }
  0xa6   :  { %470 = vrot.lane.b32.xlu2 %v1151_v38, %s1305_s27  ;;  %v325_v3 = vadd.f32 %v321_v57, %v307_v54  ;;  %v810_v54 = vmul.f32 %v809_v27, %v1328_v0 }
  0xa7   :  { %v594_v53 = vadd.f32 %v590_v43, %v576_v49  ;;  %932 = vrot.lane.b32.xlu1 %v1190_v41, %s1303_s22 }
  0xa8   :  { %930 = vrot.lane.b32.xlu0 %v1189_v46, %s1303_s22  ;;  %v839_v58 = vpop.permute.xlu2 %838  ;;  %s1160_s22 = sld [smem:[#allocation6 + $0x19]] }
  0xa9   :  { %v841_v60 = vrot.slane %v839_v58, 2  ;;  %v335_v61 = vpop.permute.xlu1 %334  ;;  %v612_v62 = vadd.f32 %v608_v51, %v594_v53  ;;  %v1196_v51 = vrot.slane %v967_v40, 9 }
  0xaa   :  { %v337_v63 = vrot.slane %v335_v61, 2  ;;  %v333_v1 = vpop.permute.xlu0 %332 }
  0xab   :  { %v843_v4 = vsel %vm78_vm1, %v839_v58, %v841_v60  ;;  %v336_v5 = vrot.slane %v333_v1, 2 }
  0xac   :  { %v847_v8 = vadd.f32 %v843_v4, %v829_v56  ;;  %v339_v9 = vsel %vm78_vm1, %v335_v61, %v337_v63 }
  0xad   :  { %v343_v14 = vadd.f32 %v339_v9, %v325_v3  ;;  %v338_v15 = vsel %vm78_vm1, %v333_v1, %v336_v5 }
  0xae   :  { %v342_v17 = vadd.f32 %v338_v15, %v324_v19  ;;  %724 = vrot.lane.b32.xlu2 %v1174_v2, %s1305_s27 }
  0xaf   :  { %722 = vrot.lane.b32.xlu1 %v1173_v6, %s1305_s27 }
  0xb0   :  { %472 = vrot.lane.b32.xlu0 %v1152_v11, %s1305_s27  ;;  %v621_v24 = vpop.permute.xlu2 %620 }
  0xb1   :  { %v624_v29 = vrot.slane %v621_v24, 2  ;;  %v819_v30 = vpop.permute.xlu1 %818 }
  0xb2   :  { %v587_v31 = vpop.permute.xlu0 %586  ;;  %v822_v48 = vrot.slane %v819_v30, 2 }
  0xb3   :  { %v626_v33 = vsel %vm116_vm3, %v621_v24, %v624_v29  ;;  %v589_v34 = vrot.slane %v587_v31, 2 }
  0xb4   :  { %v1553_v37 = vadd.f32 %v626_v33, %v612_v62  ;;  %v824_v55 = vsel %vm59_vm0, %v819_v30, %v822_v48 }
  0xb5   :  { %v591_v38 = vsel %vm78_vm1, %v587_v31, %v589_v34  ;;  %v828_v60 = vadd.f32 %v824_v55, %v810_v54  ;;  %v633_v54 = vstv %s1160_s22 }
  0xb6   :  { %v595_v39 = vadd.f32 %v591_v38, %v577_v36  ;;  %974 = vrot.lane.b32.xlu2 %v1195_v32, %s1305_s27 }
  0xb7   :  { %954 = vrot.lane.b32.xlu1 %v1193_v35, %s1302_s1 }
  0xb8   :  { %952 = vrot.lane.b32.xlu0 %v1192_v22, %s1302_s1  ;;  %v857_v28 = vpop.permute.xlu2 %856  ;;  %s1116_s1 = sld [smem:[#allocation6 + $0x5]] }
  0xb9   :  { %v859_v41 = vrot.slane %v857_v28, 2  ;;  %v353_v42 = vpop.permute.xlu1 %352 }
  0xba   :  { %v355_v43 = vrot.slane %v353_v42, 2  ;;  %v351_v44 = vpop.permute.xlu0 %350 }
  0xbb   :  { %v861_v45 = vsel %vm97_vm2, %v857_v28, %v859_v41  ;;  %v354_v46 = vrot.slane %v351_v44, 2 }
  0xbc   :  { %v865_v49 = vadd.f32 %v861_v45, %v847_v8  ;;  %v357_v50 = vsel %vm97_vm2, %v353_v42, %v355_v43 }
  0xbd   :  { %v361_v52 = vadd.f32 %v357_v50, %v343_v14  ;;  %v356_v47 = vsel %vm97_vm2, %v351_v44, %v354_v46 }
  0xbe   :  { %v360_v53 = vadd.f32 %v356_v47, %v342_v17  ;;  %v124_v45 = vstv %s1116_s1 }
  0xbf   :  { %v125_v46 = vmul.f32 %v124_v45, %v1328_v0 }
  0xc0   :  { %976 = vrot.lane.b32.xlu0 %v1196_v51, %s1305_s27  ;;  %v873_v56 = vpop.permute.xlu2 %872  ;;  %s1138_s27 = sld [smem:[#allocation6 + $0xf]] }
  0xc1   :  { %v837_v57 = vpop.permute.xlu1 %836  ;;  %v876_v12 = vrot.slane %v873_v56, 2 }
  0xc2   :  { %v840_v58 = vrot.slane %v837_v57, 2  ;;  %v605_v59 = vpop.permute.xlu0 %604 }
  0xc3   :  { %v607_v61 = vrot.slane %v605_v59, 2  ;;  %v878_v18 = vsel %vm116_vm3, %v873_v56, %v876_v12  ;;  %v635_v12 = vmul.f32 %v633_v54, %v1334_v7 }
  0xc4   :  { %v842_v62 = vsel %vm78_vm1, %v837_v57, %v840_v58 }
  0xc5   :  { %v846_v19 = vadd.f32 %v842_v62, %v828_v60  ;;  %v609_v63 = vsel %vm97_vm2, %v605_v59, %v607_v61  ;;  %v634_v62 = vmul.f32 %v633_v54, %v1328_v0 }
  0xc6   :  { %v613_v1 = vadd.f32 %v609_v63, %v595_v39  ;;  %v381_v57 = vstv %s1138_s27 }
  0xc8   :  { %v1570_v2 = vpop.permute.xlu2 %406 }
  0xc9   :  { %v371_v3 = vpop.permute.xlu1 %370 }
  0xca   :  { %v373_v27 = vrot.slane %v371_v3, 2  ;;  %v369_v4 = vpop.permute.xlu0 %368 }
  0xcb   :  { %v372_v5 = vrot.slane %v369_v4, 2 }
  0xcc   :  { %v375_v6 = vsel %vm116_vm3, %v371_v3, %v373_v27  ;;  %v382_v3 = vmul.f32 %v381_v57, %v1328_v0 }
  0xcd   :  { %v1573_v8 = vadd.f32 %v375_v6, %v361_v52  ;;  %v374_v9 = vsel %vm116_vm3, %v369_v4, %v372_v5  ;;  %v1117_v52 = vrot.slane %v125_v46, 9  ;;  %v383_v6 = vmul.f32 %v381_v57, %v1334_v7 }
  0xce   :  { %v1576_v11 = vadd.f32 %v374_v9, %v360_v53  ;;  %v126_v53 = vmul.f32 %v124_v45, %v1334_v7 }
  0xcf   :  { %v135_v58 = vadd.f32 %v1117_v52, %v1496_v23 }
  0xd0   :  { %v1578_v13 = vpop.permute.xlu2 %656 }
  0xd1   :  { %v855_v14 = vpop.permute.xlu1 %854 }
  0xd2   :  { %v858_v15 = vrot.slane %v855_v14, 2  ;;  %v623_v16 = vpop.permute.xlu0 %622 }
  0xd3   :  { %v625_v17 = vrot.slane %v623_v16, 2 }
  0xd4   :  { %v860_v10 = vsel %vm97_vm2, %v855_v14, %v858_v15 }
  0xd5   :  { %v864_v21 = vadd.f32 %v860_v10, %v846_v19  ;;  %v627_v24 = vsel %vm116_vm3, %v623_v16, %v625_v17  ;;  %v1118_v19 = vrot.slane %v126_v53, 9  ;;  %v1161_v10 = vrot.slane %v634_v62, 9 }
  0xd6   :  { %v1583_v25 = vadd.f32 %v627_v24, %v613_v1  ;;  %v885_v53 = vstv %s1619_s3 }
  0xd7   :  { %v1585_v26 = vadd.f32 %v878_v18, %v864_v21  ;;  %v136_v16 = vadd.f32 %v1118_v19, %v1492_v20  ;;  %v1139_v21 = vrot.slane %v382_v3, 9  ;;  %v644_v52 = vadd.f32 %v1161_v10, %v1553_v37 }
  0xd8   :  { %v1587_v31 = vpop.permute.xlu2 %428 }
  0xd9   :  { %v150_v29 = vpop.permute.xlu1 %149  ;;  %v431_v19 = vrot.slane %v1587_v31, 2 }
  0xda   :  { %v148_v30 = vpop.permute.xlu0 %147  ;;  %v152_v59 = vrot.slane %v150_v29, 2 }
  0xdb   :  { %v151_v50 = vrot.slane %v148_v30, 2 }
  0xdc   :  { %v154_v9 = vsel %vm59_vm0, %v150_v29, %v152_v59 }
  0xdd   :  { %v153_v55 = vsel %vm59_vm0, %v148_v30, %v151_v50 }
  0xde   :  { %v157_v63 = vadd.f32 %v153_v55, %v135_v58  ;;  %v409_v55 = vrot.slane %v1570_v2, 2 }
  0xe0   :  { %v1591_v35 = vpop.permute.xlu2 %678 }
  0xe1   :  { %v1589_v32 = vpop.permute.xlu1 %404 }
  0xe2   :  { %v875_v33 = vpop.permute.xlu0 %874  ;;  %v408_v17 = vrot.slane %v1589_v32, 2 }
  0xe3   :  { %v877_v34 = vrot.slane %v875_v33, 2 }
  0xe4   :  { %v410_v45 = vsel %vm59_vm0, %v1589_v32, %v408_v17 }
  0xe5   :  { %v879_v36 = vsel %vm116_vm3, %v875_v33, %v877_v34  ;;  %v158_v33 = vadd.f32 %v154_v9, %v136_v16  ;;  %v1140_v34 = vrot.slane %v383_v6, 9 }
  0xe6   :  { %v1594_v22 = vadd.f32 %v879_v36, %v865_v49  ;;  %v660_v36 = vrot.slane %v1578_v13, 2 }
  0xe7   :  { %v393_v57 = vadd.f32 %v1140_v34, %v1573_v8  ;;  %v682_v8 = vrot.slane %v1591_v35, 2 }
  0xe8   :  { %v1596_v28 = vpop.permute.xlu2 %910  ;;  %v662_v58 = vsel %vm59_vm0, %v1578_v13, %v660_v36 }
  0xe9   :  { %v172_v38 = vpop.permute.xlu1 %171  ;;  %v684_v36 = vsel %vm78_vm1, %v1591_v35, %v682_v8 }
  0xea   :  { %v170_v39 = vpop.permute.xlu0 %169  ;;  %v174_v27 = vrot.slane %v172_v38, 2 }
  0xeb   :  { %v173_v47 = vrot.slane %v170_v39, 2 }
  0xec   :  { %v176_v24 = vsel %vm78_vm1, %v172_v38, %v174_v27 }
  0xed   :  { %v175_v60 = vsel %vm78_vm1, %v170_v39, %v173_v47  ;;  %v1162_v39 = vrot.slane %v635_v12, 9  ;;  %v180_v46 = vadd.f32 %v176_v24, %v158_v33  ;;  %v392_v47 = vadd.f32 %v1139_v21, %v1576_v11 }
  0xee   :  { %v179_v23 = vadd.f32 %v175_v60, %v157_v63  ;;  %v411_v33 = vsel %vm59_vm0, %v1570_v2, %v409_v55 }
  0xef   :  { %v414_v59 = vadd.f32 %v410_v45, %v392_v47  ;;  %v645_v11 = vadd.f32 %v1162_v39, %v1583_v25  ;;  %v666_v45 = vadd.f32 %v662_v58, %v644_v52 }
  0xf0   :  { %v214_v42 = vpop.permute.xlu2 %213 }
  0xf1   :  { %v1598_v40 = vpop.permute.xlu1 %426  ;;  %v217_v4 = vrot.slane %v214_v42, 2  ;;  %v688_v47 = vadd.f32 %v684_v36, %v666_v45 }
  0xf2   :  { %v1600_v41 = vpop.permute.xlu0 %658  ;;  %v430_v29 = vrot.slane %v1598_v40, 2 }
  0xf3   :  { %v219_v30 = vsel %vm116_vm3, %v214_v42, %v217_v4  ;;  %v661_v38 = vrot.slane %v1600_v41, 2 }
  0xf5   :  { %v663_v60 = vsel %vm59_vm0, %v1600_v41, %v661_v38  ;;  %v415_v38 = vadd.f32 %v411_v33, %v393_v57  ;;  %v887_v57 = vmul.f32 %v885_v53, %v1334_v7 }
  0xf8   :  { %v1607_v51 = vpop.permute.xlu2 %702 }
  0xf9   :  { %v194_v43 = vpop.permute.xlu1 %193  ;;  %v705_v27 = vrot.slane %v1607_v51, 2 }
  0xfa   :  { %v192_v44 = vpop.permute.xlu0 %191  ;;  %v196_v14 = vrot.slane %v194_v43, 2 }
  0xfb   :  { %v195_v56 = vrot.slane %v192_v44, 2  ;;  %v707_v10 = vsel %vm97_vm2, %v1607_v51, %v705_v27 }
  0xfd   :  { %v197_v5 = vsel %vm97_vm2, %v192_v44, %v195_v56  ;;  %v198_v44 = vsel %vm97_vm2, %v194_v43, %v196_v14  ;;  %v432_v43 = vsel %vm78_vm1, %v1598_v40, %v430_v29  ;;  %v886_v29 = vmul.f32 %v885_v53, %v1328_v0 }
  0xfe   :  { %v201_v18 = vadd.f32 %v197_v5, %v179_v23  ;;  %v202_v56 = vadd.f32 %v198_v44, %v180_v46  ;;  %v436_v63 = vadd.f32 %v432_v43, %v414_v59  ;;  %v667_v5 = vadd.f32 %v663_v60, %v645_v11 }
  0xff   :  { %v433_v46 = vsel %vm78_vm1, %v1587_v31, %v431_v19  ;;  %v1183_v43 = vrot.slane %v886_v29, 9 }
 0x100   :  { %v1625_v15 = vpop.permute.xlu2 %470  ;;  %v1639_v50 = vadd.f32 %v219_v30, %v201_v18  ;;  %v437_v31 = vadd.f32 %v433_v46, %v415_v38 }
 0x101   :  { %v1603_v48 = vpop.permute.xlu1 %908  ;;  %v896_v7 = vadd.f32 %v1183_v43, %v1585_v26 }
 0x102   :  { %v1605_v49 = vpop.permute.xlu0 %680  ;;  %v225_v40 = vmul.f32 %v1639_v50, %v1639_v50  ;;  %v229_v14 = vperm.slane %v1639_v50, 0 }
 0x103   :  { %v683_v32 = vrot.slane %v1605_v49, 2 }
 0x104   :  { %v236_v16 = vperm.slane %v225_v40, 0 }
 0x105   :  { %v685_v25 = vsel %vm78_vm1, %v1605_v49, %v683_v32  ;;  %v474_v49 = vrot.slane %v1625_v15, 2 }
 0x106   :  { %v689_v17 = vadd.f32 %v685_v25, %v667_v5 }
 0x107   :  { %v476_v0 = vsel %vm116_vm3, %v1625_v15, %v474_v49 }
 0x108   :  { %v725_v3 = vpop.permute.xlu2 %724  ;;  %v711_v2 = vadd.f32 %v707_v10, %v689_v17 }
 0x109   :  { %v1613_v61 = vpop.permute.xlu1 %450  ;;  %v727_v6 = vrot.slane %v725_v3, 2 }
 0x10a   :  { %v1616_v1 = vpop.permute.xlu0 %448  ;;  %v453_v34 = vrot.slane %v1613_v61, 2 }
 0x10b   :  { %v452_v13 = vrot.slane %v1616_v1, 2  ;;  %v729_v51 = vsel %vm116_vm3, %v725_v3, %v727_v6  ;;  %v1184_v3 = vrot.slane %v887_v57, 9 }
 0x10c   :  { %v455_v52 = vsel %vm97_vm2, %v1613_v61, %v453_v34 }
 0x10d   :  { %v454_v18 = vsel %vm97_vm2, %v1616_v1, %v452_v13  ;;  %v459_v11 = vadd.f32 %v455_v52, %v437_v31  ;;  %v897_v45 = vadd.f32 %v1184_v3, %v1594_v22 }
 0x10e   :  { %v458_v39 = vadd.f32 %v454_v18, %v436_v63 }
 0x110   :  { %v975_v27 = vpop.permute.xlu2 %974 }
 0x111   :  { %v1634_v20 = vpop.permute.xlu1 %700  ;;  %v978_v18 = vrot.slane %v975_v27, 2 }
 0x112   :  { %v216_v42 = vpop.permute.xlu0 %215  ;;  %v704_v21 = vrot.slane %v1634_v20, 2 }
 0x113   :  { %v218_v54 = vrot.slane %v216_v42, 2  ;;  %v980_v38 = vsel %vm116_vm3, %v975_v27, %v978_v18 }
 0x114   :  { %v706_v35 = vsel %vm97_vm2, %v1634_v20, %v704_v21  ;;  %v913_v20 = vrot.slane %v1596_v28, 2 }
 0x115   :  { %v220_v37 = vsel %vm116_vm3, %v216_v42, %v218_v54  ;;  %v912_v42 = vrot.slane %v1603_v48, 2  ;;  %v1697_v54 = vadd.f32 %v729_v51, %v711_v2  ;;  %v710_v58 = vadd.f32 %v706_v35, %v688_v47 }
 0x116   :  { %v1655_v62 = vadd.f32 %v220_v37, %v202_v56  ;;  %v1701_v56 = vadd.f32 %v476_v0, %v458_v39  ;;  %v915_v25 = vsel %vm59_vm0, %v1596_v28, %v913_v20 }
 0x117   :  { %v914_v37 = vsel %vm59_vm0, %v1603_v48, %v912_v42  ;;  %v735_v60 = vmul.f32 %v1697_v54, %v1697_v54  ;;  %v739_v5 = vperm.slane %v1697_v54, 0  ;;  %v919_v42 = vadd.f32 %v915_v25, %v897_v45 }
 0x118   :  { %v226_v41 = vmul.f32 %v1655_v62, %v1655_v62  ;;  %v230_v4 = vperm.slane %v1655_v62, 0  ;;  %v482_v63 = vmul.f32 %v1701_v56, %v1701_v56  ;;  %v486_v10 = vperm.slane %v1701_v56, 0 }
 0x119   :  { %v1668_v23 = vpop.permute.xlu1 %932  ;;  %v745_v6 = vperm.slane %v735_v60, 0 }
 0x11a   :  { %v237_v9 = vperm.slane %v226_v41, 0  ;;  %v931_v12 = vpop.permute.xlu0 %930  ;;  %v232_v24 = vsel %vm231_vm4, %v230_v4, %v229_v14  ;;  %v918_v41 = vadd.f32 %v914_v37, %v896_v7  ;;  %v492_v21 = vperm.slane %v482_v63, 0 }
 0x11b   :  { %v934_v40 = vrot.slane %v931_v12, 2  ;;  %v935_v28 = vrot.slane %v1668_v23, 2 }
 0x11c   :  { %v239_v30 = vsel %vm238_vm5, %v237_v9, %v236_v16 }
 0x11d   :  { %v242_v1 = vsel %vm241_vm6, %v232_v24, %v239_v30  ;;  %v936_v9 = vsel %vm78_vm1, %v931_v12, %v934_v40  ;;  %v937_v2 = vsel %vm78_vm1, %v1668_v23, %v935_v28 }
 0x11e   :  { %v244_v44 = vsel %vm243_vm7, %v242_v1, 0.0  ;;  %v940_v29 = vadd.f32 %v936_v9, %v918_v41  ;;  %v941_v47 = vadd.f32 %v937_v2, %v919_v42 }
 0x11f   :  { %245 = vadd.xlane.f32.xlu1 %v244_v44 }
 0x121   :  { %v723_v55 = vpop.permute.xlu1 %722 }
 0x122   :  { %v726_v15 = vrot.slane %v723_v55, 2  ;;  %v473_v32 = vpop.permute.xlu0 %472 }
 0x123   :  { %v475_v59 = vrot.slane %v473_v32, 2 }
 0x124   :  { %v728_v61 = vsel %vm116_vm3, %v723_v55, %v726_v15 }
 0x125   :  { %v1712_v19 = vadd.f32 %v728_v61, %v710_v58  ;;  %v477_v8 = vsel %vm116_vm3, %v473_v32, %v475_v59 }
 0x126   :  { %v1716_v53 = vadd.f32 %v477_v8, %v459_v11 }
 0x127   :  { %v734_v48 = vmul.f32 %v1712_v19, %v1712_v19  ;;  %v738_v13 = vperm.slane %v1712_v19, 0 }
 0x128   :  { %v483_v4 = vmul.f32 %v1716_v53, %v1716_v53  ;;  %v487_v26 = vperm.slane %v1716_v53, 0 }
 0x129   :  { %v744_v14 = vperm.slane %v734_v48, 0  ;;  %v955_v49 = vpop.permute.xlu1 %954  ;;  %v740_v30 = vsel %vm231_vm4, %v739_v5, %v738_v13 }
 0x12a   :  { %v493_v16 = vperm.slane %v483_v4, 0  ;;  %v953_v17 = vpop.permute.xlu0 %952  ;;  %v488_v12 = vsel %vm231_vm4, %v487_v26, %v486_v10  ;;  %v957_v36 = vrot.slane %v955_v49, 2 }
 0x12b   :  { %v956_v24 = vrot.slane %v953_v17, 2  ;;  %v746_v33 = vsel %vm238_vm5, %v745_v6, %v744_v14 }
 0x12c   :  { %v748_v34 = vsel %vm241_vm6, %v740_v30, %v746_v33  ;;  %v494_v1 = vsel %vm238_vm5, %v493_v16, %v492_v21  ;;  %v959_v35 = vsel %vm97_vm2, %v955_v49, %v957_v36 }
 0x12d   :  { %v958_v51 = vsel %vm97_vm2, %v953_v17, %v956_v24  ;;  %v749_v39 = vsel %vm243_vm7, %v748_v34, 0.0  ;;  %v496_v44 = vsel %vm241_vm6, %v488_v12, %v494_v1  ;;  %v963_v43 = vadd.f32 %v959_v35, %v941_v47 }
 0x12e   :  { %v962_v46 = vadd.f32 %v958_v51, %v940_v29  ;;  %750 = vadd.xlane.f32.xlu0 %v749_v39  ;;  %v497_v0 = vsel %vm243_vm7, %v496_v44, 0.0 }
 0x12f   :  { %498 = vadd.xlane.f32.xlu2 %v497_v0 }
 0x130   :  { %v1746_v52 = vadd.f32 %v980_v38, %v962_v46 }
 0x132   :  { %v977_v55 = vpop.permute.xlu0 %976  ;;  %v986_v15 = vmul.f32 %v1746_v52, %v1746_v52  ;;  %v990_v58 = vperm.slane %v1746_v52, 0 }
 0x133   :  { %v979_v31 = vrot.slane %v977_v55, 2 }
 0x134   :  { %v996_v59 = vperm.slane %v986_v15, 0 }
 0x135   :  { %v981_v22 = vsel %vm116_vm3, %v977_v55, %v979_v31 }
 0x136   :  { %v1751_v32 = vadd.f32 %v981_v22, %v963_v43 }
 0x138   :  { %v987_v23 = vmul.f32 %v1751_v32, %v1751_v32  ;;  %v991_v57 = vperm.slane %v1751_v32, 0 }
 0x13a   :  { %v997_v20 = vperm.slane %v987_v23, 0  ;;  %v992_v37 = vsel %vm231_vm4, %v991_v57, %v990_v58 }
 0x13c   :  { %v998_v11 = vsel %vm238_vm5, %v997_v20, %v996_v59  ;;  %vm1081_vm5 = vcmask 1040384  }
 0x13d   :  { %v1000_v61 = vsel %vm241_vm6, %v992_v37, %v998_v11 }
 0x13e   :  { %v1001_v60 = vsel %vm243_vm7, %v1000_v61, 0.0 }
 0x13f   :  { %1002 = vadd.xlane.f32.xlu2 %v1001_v60 }
 0x192   :  { %v246_v40 = vpop.xlane.xlu1 %245 }
 0x193   :  { %v248_v8 = vsel %vm247_vm8, %v246_v40, 0.0  ;;  %v260_v25 = vrot.slane %v246_v40, 2 }
 0x194   :  { %249 = vadd.xlane.f32.xlu1 %v248_v8 }
 0x195   :  { %v262_v4 = vsel %vm247_vm8, %v260_v25, 0.0 }
 0x1a1   :  { %v751_v7 = vpop.xlane.xlu0 %750 }
 0x1a2   :  { %v499_v63 = vpop.xlane.xlu2 %498  ;;  %v752_v3 = vsel %vm247_vm8, %v751_v7, 0.0  ;;  %v764_v41 = vrot.slane %v751_v7, 2 }
 0x1a3   :  { %v512_v48 = vrot.slane %v499_v63, 2  ;;  %v500_v13 = vsel %vm247_vm8, %v499_v63, 0.0  ;;  %753 = vadd.xlane.f32.xlu2 %v752_v3 }
 0x1a4   :  { %501 = vadd.xlane.f32.xlu0 %v500_v13  ;;  %v766_v26 = vsel %vm247_vm8, %v764_v41, 0.0 }
 0x1a5   :  { %v514_v27 = vsel %vm247_vm8, %v512_v48, 0.0 }
 0x1a6   :  { %515 = vadd.xlane.f32.xlu1 %v514_v27 }
 0x1ab   :  { %263 = vadd.xlane.f32.xlu2 %v262_v4 }
 0x1ac   :  { %767 = vadd.xlane.f32.xlu0 %v766_v26 }
 0x1b2   :  { %v1003_v5 = vpop.xlane.xlu2 %1002 }
 0x1b3   :  { %v1016_v6 = vrot.slane %v1003_v5, 2  ;;  %v1004_v9 = vsel %vm247_vm8, %v1003_v5, 0.0 }
 0x1b4   :  { %1005 = vadd.xlane.f32.xlu1 %v1004_v9 }
 0x1b5   :  { %v1018_v14 = vsel %vm247_vm8, %v1016_v6, 0.0  ;;  %vm1084_vm8 = vcmask 1042432  }
 0x1b6   :  { %1019 = vadd.xlane.f32.xlu2 %v1018_v14 }
 0x207   :  { %v250_v16 = vpop.xlane.xlu1 %249 }
 0x208   :  { %v251_v49 = vrot.slane %v250_v16, 4 }
 0x20a   :  { %v252_v17 = vadd.f32 %v251_v49, %v250_v16 }
 0x20c   :  { %v253_v18 = vrot.slane %v252_v17, 2 }
 0x20e   :  { %v254_v10 = vadd.f32 %v253_v18, %v252_v17 }
 0x210   :  { %v255_v21 = vrot.slane %v254_v10, 1 }
 0x212   :  { %v256_v28 = vadd.f32 %v255_v21, %v254_v10 }
 0x214   :  { %1199 = vpush %v256_v28 }
 0x216   :  { %v754_v24 = vpop.xlane.xlu2 %753 }
 0x217   :  { %v502_v30 = vpop.xlane.xlu0 %501  ;;  %v755_v33 = vrot.slane %v754_v24, 4 }
 0x218   :  { %v503_v29 = vrot.slane %v502_v30, 4 }
 0x219   :  { %v516_v34 = vpop.xlane.xlu1 %515  ;;  %v756_v36 = vadd.f32 %v755_v33, %v754_v24 }
 0x21a   :  { %v504_v12 = vadd.f32 %v503_v29, %v502_v30  ;;  %v517_v1 = vrot.slane %v516_v34, 4 }
 0x21b   :  { %v757_v2 = vrot.slane %v756_v36, 2 }
 0x21c   :  { %v518_v51 = vadd.f32 %v517_v1, %v516_v34  ;;  %v505_v39 = vrot.slane %v504_v12, 2 }
 0x21d   :  { %v758_v22 = vadd.f32 %v757_v2, %v756_v36 }
 0x21e   :  { %v264_v44 = vpop.xlane.xlu2 %263  ;;  %v519_v45 = vrot.slane %v518_v51, 2  ;;  %v506_v47 = vadd.f32 %v505_v39, %v504_v12 }
 0x21f   :  { %v768_v46 = vpop.xlane.xlu0 %767  ;;  %v265_v0 = vrot.slane %v264_v44, 4  ;;  %v759_v11 = vrot.slane %v758_v22, 1 }
 0x220   :  { %v769_v38 = vrot.slane %v768_v46, 4  ;;  %v520_v31 = vadd.f32 %v519_v45, %v518_v51  ;;  %v507_v57 = vrot.slane %v506_v47, 1 }
 0x221   :  { %v266_v42 = vadd.f32 %v265_v0, %v264_v44  ;;  %v760_v25 = vadd.f32 %v759_v11, %v758_v22 }
 0x222   :  { %v770_v35 = vadd.f32 %v769_v38, %v768_v46  ;;  %v521_v20 = vrot.slane %v520_v31, 1  ;;  %v508_v63 = vadd.f32 %v507_v57, %v506_v47 }
 0x223   :  { %v267_v55 = vrot.slane %v266_v42, 2 }
 0x224   :  { %v771_v43 = vrot.slane %v770_v35, 2  ;;  %v522_v3 = vadd.f32 %v521_v20, %v520_v31 }
 0x225   :  { %v268_v15 = vadd.f32 %v267_v55, %v266_v42 }
 0x226   :  { %v772_v23 = vadd.f32 %v771_v43, %v770_v35 }
 0x227   :  { %v1006_v58 = vpop.xlane.xlu1 %1005  ;;  %v269_v59 = vrot.slane %v268_v15, 1 }
 0x228   :  { %v1007_v37 = vrot.slane %v1006_v58, 4  ;;  %v773_v61 = vrot.slane %v772_v23, 1 }
 0x229   :  { %v1020_v60 = vpop.xlane.xlu2 %1019  ;;  %v270_v40 = vadd.f32 %v269_v59, %v268_v15 }
 0x22a   :  { %v1008_v8 = vadd.f32 %v1007_v37, %v1006_v58  ;;  %v1021_v7 = vrot.slane %v1020_v60, 4  ;;  %v774_v48 = vadd.f32 %v773_v61, %v772_v23 }
 0x22b   :  { %1201 = vpush %v270_v40 }
 0x22c   :  { %v1009_v13 = vrot.slane %v1008_v8, 2  ;;  %v1022_v27 = vadd.f32 %v1021_v7, %v1020_v60  ;;  %1203 = vpush %v508_v63 }
 0x22d   :  { %1205 = vpush %v522_v3 }
 0x22e   :  { %v1010_v41 = vadd.f32 %v1009_v13, %v1008_v8  ;;  %v1023_v4 = vrot.slane %v1022_v27, 2  ;;  %1207 = vpush %v760_v25 }
 0x22f   :  { %1209 = vpush %v774_v48  ;;  %v290_v48 = vstv %s1785_s12 }
 0x230   :  { %v1024_v26 = vadd.f32 %v1023_v4, %v1022_v27  ;;  %v1011_v5 = vrot.slane %v1010_v41, 1 }
 0x232   :  { %v1012_v6 = vadd.f32 %v1011_v5, %v1010_v41  ;;  %v1025_v9 = vrot.slane %v1024_v26, 1  ;;  %v542_v41 = vstv %s1787_s13 }
 0x234   :  { %1211 = vpush %v1012_v6  ;;  %v1026_v14 = vadd.f32 %v1025_v9, %v1024_v26 }
 0x236   :  { %1213 = vpush %v1026_v14 }
 0x245   :  { %s1200_s4 = spop %1199 }
 0x246   :  { %v258_v16 = vstv %s1200_s4 }
 0x247   :  { %v1769_v49 = vmul.f32 0.00390625, %v258_v16 }
 0x249   :  { %v275_v18 = vmul.f32 %v1769_v49, %v1769_v49 }
 0x25c   :  { %s1202_s5 = spop %1201 }
 0x25d   :  { %v272_v17 = vstv %s1202_s5  ;;  %s1204_s6 = spop %1203 }
 0x25e   :  { %v274_v10 = vmul.f32 0.00390625, %v272_v17  ;;  %v510_v21 = vstv %s1204_s6  ;;  %s1206_s7 = spop %1205  ;;  %v794_v17 = vstv %s1789_s14 }
 0x25f   :  { %v1773_v28 = vmul.f32 0.00390625, %v510_v21  ;;  %v524_v24 = vstv %s1206_s7  ;;  %s1208_s8 = spop %1207 }
 0x260   :  { %v276_v30 = vsub.f32 %v274_v10, %v275_v18  ;;  %v762_v33 = vstv %s1208_s8  ;;  %s1210_s9 = spop %1209  ;;  %v526_v34 = vmul.f32 0.00390625, %v524_v24 }
 0x261   :  { %v527_v29 = vmul.f32 %v1773_v28, %v1773_v28  ;;  %v1777_v12 = vmul.f32 0.00390625, %v762_v33  ;;  %v776_v1 = vstv %s1210_s9 }
 0x262   :  { %v277_v36 = vmax.f32 %v276_v30, 0.0  ;;  %v778_v44 = vmul.f32 0.00390625, %v776_v1  ;;  %v546_v30 = vstv %s1791_s15 }
 0x263   :  { %v528_v51 = vsub.f32 %v526_v34, %v527_v29  ;;  %v779_v39 = vmul.f32 %v1777_v12, %v1777_v12  ;;  %v294_v34 = vstv %s1794_s16 }
 0x264   :  { %v279_v45 = vadd.f32 1e-05, %v277_v36  ;;  %v798_v36 = vstv %s1796_s17 }
 0x265   :  { %v529_v46 = vmax.f32 %v528_v51, 0.0  ;;  %v780_v0 = vsub.f32 %v778_v44, %v779_v39  ;;  %s1212_s10 = spop %1211 }
 0x266   :  { %1224 = vrsqrt.f32 %v279_v45  ;;  %v1014_v2 = vstv %s1212_s10  ;;  %vm286_vm10 = vweird.f32 %v279_v45 }
 0x267   :  { %v531_v38 = vadd.f32 1e-05, %v529_v46  ;;  %v781_v42 = vmax.f32 %v780_v0, 0.0  ;;  %v1781_v35 = vmul.f32 0.00390625, %v1014_v2  ;;  %s1214_s11 = spop %1213  ;;  %v1046_v46 = vstv %s1799_s18 }
 0x268   :  { %v1028_v47 = vstv %s1214_s11 }
 0x269   :  { %1226 = vrsqrt.f32 %v531_v38  ;;  %v783_v55 = vadd.f32 1e-05, %v781_v42  ;;  %v1031_v31 = vmul.f32 %v1781_v35, %v1781_v35  ;;  %v1030_v43 = vmul.f32 0.00390625, %v1028_v47 }
 0x26a   :  { %vm538_vm13 = vweird.f32 %v531_v38 }
 0x26b   :  { %1228 = vrsqrt.f32 %v783_v55  ;;  %v1032_v15 = vsub.f32 %v1030_v43, %v1031_v31  ;;  %vm790_vm0 = vweird.f32 %v783_v55 }
 0x26c   :  { %v1225_v22 = vpop.eup %1224 }
 0x26d   :  { %v281_v23 = vmul.f32 %v1225_v22, %v279_v45  ;;  %v1033_v57 = vmax.f32 %v1032_v15, 0.0  ;;  %vm287_vm9 = vweird.f32 %v1225_v22 }
 0x26e   :  { %vm288_vm11 = vmor %vm286_vm10, %vm287_vm9  ;;  %vm1087_vm9 = vcmask 1044480   ;;  %vm1089_vm10 = vcmask 1045504  }
 0x26f   :  { %v1227_v58 = vpop.eup %1226  ;;  %v282_v59 = vmul.f32 %v1225_v22, %v281_v23  ;;  %v1035_v37 = vadd.f32 1e-05, %v1033_v57 }
 0x270   :  { %v533_v20 = vmul.f32 %v1227_v58, %v531_v38  ;;  %vm539_vm12 = vweird.f32 %v1227_v58 }
 0x271   :  { %v1229_v11 = vpop.eup %1228  ;;  %v283_v61 = vmul.f32 0.5, %v282_v59  ;;  %1230 = vrsqrt.f32 %v1035_v37  ;;  %vm540_vm15 = vmor %vm538_vm13, %vm539_vm12  ;;  %vm1042_vm3 = vweird.f32 %v1035_v37 }
 0x272   :  { %v534_v60 = vmul.f32 %v1227_v58, %v533_v20  ;;  %v785_v40 = vmul.f32 %v1229_v11, %v783_v55  ;;  %vm791_vm14 = vweird.f32 %v1229_v11 }
 0x273   :  { %v284_v8 = vsub.f32 1.5, %v283_v61  ;;  %vm792_vm1 = vmor %vm790_vm0, %vm791_vm14 }
 0x274   :  { %v535_v7 = vmul.f32 0.5, %v534_v60  ;;  %v786_v63 = vmul.f32 %v1229_v11, %v785_v40 }
 0x275   :  { %v285_v3 = vmul.f32 %v1225_v22, %v284_v8 }
 0x276   :  { %v536_v13 = vsub.f32 1.5, %v535_v7  ;;  %v787_v27 = vmul.f32 0.5, %v786_v63 }
 0x277   :  { %v289_v25 = vsel %vm288_vm11, %v1225_v22, %v285_v3  ;;  %v1231_v4 = vpop.eup %1230  ;;  %vm1091_vm11 = vcmask 1046528  }
 0x278   :  { %v291_v26 = vmul.f32 %v290_v48, %v289_v25  ;;  %v537_v5 = vmul.f32 %v1227_v58, %v536_v13  ;;  %v788_v6 = vsub.f32 1.5, %v787_v27  ;;  %v1037_v9 = vmul.f32 %v1231_v4, %v1035_v37 }
 0x279   :  { %vm1043_vm2 = vweird.f32 %v1231_v4 }
 0x27a   :  { %v541_v14 = vsel %vm540_vm15, %v1227_v58, %v537_v5  ;;  %v789_v16 = vmul.f32 %v1229_v11, %v788_v6  ;;  %v1038_v10 = vmul.f32 %v1231_v4, %v1037_v9  ;;  %v293_v21 = vmul.f32 %v291_v26, %v1769_v49  ;;  %vm1044_vm4 = vmor %vm1042_vm3, %vm1043_vm2 }
 0x27b   :  { %v543_v18 = vmul.f32 %v542_v41, %v541_v14  ;;  %v297_v55 = vmul.f32 %v291_v26, %v1655_v62  ;;  %v1050_v58 = vstv %s1806_s19 }
 0x27c   :  { %v793_v24 = vsel %vm792_vm1, %v1229_v11, %v789_v16  ;;  %v1039_v29 = vmul.f32 0.5, %v1038_v10  ;;  %v295_v49 = vsub.f32 %v294_v34, %v293_v21 }
 0x27d   :  { %v795_v33 = vmul.f32 %v794_v17, %v793_v24  ;;  %v545_v1 = vmul.f32 %v543_v18, %v1773_v28  ;;  %v548_v51 = vmul.f32 %v543_v18, %v1701_v56  ;;  %v296_v28 = vmul.f32 %v291_v26, %v1639_v50 }
 0x27e   :  { %v1040_v39 = vsub.f32 1.5, %v1039_v29  ;;  %v299_v15 = vadd.f32 %v297_v55, %v295_v49 }
 0x27f   :  { %v547_v44 = vsub.f32 %v546_v30, %v545_v1  ;;  %v797_v45 = vmul.f32 %v795_v33, %v1777_v12  ;;  %v800_v42 = vmul.f32 %v795_v33, %v1712_v19  ;;  %v298_v22 = vadd.f32 %v296_v28, %v295_v49 }
 0x280   :  { %v1041_v0 = vmul.f32 %v1231_v4, %v1040_v39  ;;  %v549_v12 = vmul.f32 %v543_v18, %v1716_v53  ;;  %v801_v23 = vmul.f32 %v795_v33, %v1697_v54  ;;  %v301_v60 = vmax.f32 %v299_v15, 123.0 }
 0x281   :  { %v550_v2 = vadd.f32 %v548_v51, %v547_v44  ;;  %v799_v38 = vsub.f32 %v798_v36, %v797_v45  ;;  %v300_v37 = vmax.f32 %v298_v22, 123.0 }
 0x282   :  { %v1045_v47 = vsel %vm1044_vm4, %v1231_v4, %v1041_v0  ;;  %v551_v59 = vadd.f32 %v549_v12, %v547_v44  ;;  %v303_v27 = vmin.f32 %v301_v60, 457.0 }
 0x283   :  { %v552_v56 = vmax.f32 %v550_v2, 123.0  ;;  %v802_v31 = vadd.f32 %v800_v42, %v799_v38  ;;  %v1047_v43 = vmul.f32 %v1046_v46, %v1045_v47  ;;  %v803_v50 = vadd.f32 %v801_v23, %v799_v38 }
 0x284   :  { %v553_v8 = vmax.f32 %v551_v59, 123.0  ;;  %v302_v3 = vmin.f32 %v300_v37, 457.0  ;;  %v1070_v5 = vperm.slane %v303_v27, 0 }
 0x285   :  { %v804_v57 = vmax.f32 %v802_v31, 123.0  ;;  %v554_v20 = vmin.f32 %v552_v56, 457.0  ;;  %v1049_v19 = vmul.f32 %v1047_v43, %v1781_v35  ;;  %v1052_v62 = vmul.f32 %v1047_v43, %v1746_v52 }
 0x286   :  { %v1053_v61 = vmul.f32 %v1047_v43, %v1751_v32  ;;  %v805_v54 = vmax.f32 %v803_v50, 123.0  ;;  %v555_v25 = vmin.f32 %v553_v8, 457.0 }
 0x287   :  { %v1051_v11 = vsub.f32 %v1050_v58, %v1049_v19  ;;  %v806_v40 = vmin.f32 %v804_v57, 457.0  ;;  %v1061_v63 = vperm.slane %v554_v20, 0 }
 0x288   :  { %v807_v26 = vmin.f32 %v805_v54, 457.0  ;;  %v1073_v9 = vperm.slane %v555_v25, 0 }
 0x289   :  { %v1054_v53 = vadd.f32 %v1052_v62, %v1051_v11  ;;  %v1055_v7 = vadd.f32 %v1053_v61, %v1051_v11  ;;  %v1064_v35 = vperm.slane %v806_v40, 0  ;;  %v1082_v4 = vsel %vm1081_vm5, %v302_v3, %v1061_v63 }
 0x28a   :  { %v1076_v16 = vperm.slane %v807_v26, 0 }
 0x28b   :  { %v1056_v48 = vmax.f32 %v1054_v53, 123.0  ;;  %v1057_v13 = vmax.f32 %v1055_v7, 123.0  ;;  %v1083_v6 = vsel %vm241_vm6, %v1082_v4, %v1064_v35 }
 0x28d   :  { %v1058_v41 = vmin.f32 %v1056_v48, 457.0  ;;  %v1059_v52 = vmin.f32 %v1057_v13, 457.0 }
 0x28f   :  { %v1067_v32 = vperm.slane %v1058_v41, 0  ;;  %v1079_v18 = vperm.slane %v1059_v52, 0 }
 0x291   :  { %v1085_v14 = vsel %vm1084_vm8, %v1083_v6, %v1067_v32 }
 0x292   :  { %v1086_v17 = vsel %vm243_vm7, %v1085_v14, %v1070_v5 }
 0x293   :  { %v1088_v10 = vsel %vm1087_vm9, %v1086_v17, %v1073_v9 }
 0x294   :  { %v1090_v21 = vsel %vm1089_vm10, %v1088_v10, %v1076_v16 }
 0x295   :  { %v1092_v24 = vsel %vm1091_vm11, %v1090_v21, %v1079_v18 }
 0x296   :  { %1093 = vst [vmem:[#allocation7] sm:$0xff] %v1092_v24 }
 0x297   :  { %1104 = dma.vmem_to_hbm [thread:$0]  %s1100_s20, 128, %s1102_s24, [#allocation4]  }
 0x298   :  { %1296 = dma.done.wait [#allocation4], 128  }
 0x299   :  { %1297 = vsyncadd [#allocation4], 4294967168 }
 0x29a   :  { %1109 = vsyncpa [#allocation3], 1 }
 0x29b   :  { %1110 = vsyncpa [#allocation4], 1 }
 0x29c   :  { %1111 = vsyncpa [#allocation5], 1 }

</bundles_post_ra>
